<compile_context>
chip_gen: v5e
topology: v5e:2x2
jax: 0.10.0
libtpu: 0.0.40
codegen_flags: <defaults>
</compile_context>

<pallas_src>
import jax
import jax.numpy as jnp
from jax.experimental import pallas as pl
from jax.experimental.pallas import tpu as pltpu

LANE = 128        # TPU lane width; per-gate column block and padded hidden width
EMB = 30          # embedding dim fixed by the module (nn.Embedding(output, 30))
NEG_BIG = -1e30   # fills padded vocab lanes of the output bias (excluded from softmax)


# ---------------------------------------------------------------------------
# Pallas kernel: full decode sequence in one invocation (no grid)
# ---------------------------------------------------------------------------
def decoder_gru_kernel(
    tok_ref,     # (T,) int32 in SMEM
    emb_ref,     # (V, 1, 128) f32 embedding table (VMEM resident)
    wi_ref,      # (128, 4*128) bf16 fused input weights  [Wir | Wiz | Win | 0  ]
    wh_ref,      # (128, 4*128) bf16 fused hidden weights [Whr | Whz | 0   | Whn]
    b_ref,       # (1, 4*128)   f32 fused biases [bir+bhr | biz+bhz | bin | bhn]
    wout_ref,    # (128, Vp)    bf16 output projection (zero-padded rows/cols)
    bout_ref,    # (1, Vp)      f32 output bias, padded lanes = NEG_BIG
    h0_ref,      # (1, 128)     f32 initial hidden (padded lanes zero)
    out_ref,     # (T, Vp)      f32 log-softmax outputs, written once
    hout_ref,    # (1, 128)     f32 final hidden state
):
    T = out_ref.shape[0]

    # ---- Embedding gather + ReLU for every step (table is VMEM-resident). ----
    rows = [jnp.maximum(emb_ref[tok_ref[t]], 0.0) for t in range(T)]  # T x (1,128)
    x_all = jnp.concatenate(rows, axis=0)                             # (T, 128) f32

    # ---- Hoisted input projection: one M=T MXU call off the serial chain. ----
    # Gate layout per 128-lane block: [r | z | nx | nh]; bias folded in here.
    xi = jnp.dot(x_all.astype(jnp.bfloat16), wi_ref[...],
                 preferred_element_type=jnp.float32) + b_ref[...]     # (T, 4*128)

    # ---- Serial GRU recurrence: exactly ONE small matmul per step. -----------
    wh = wh_ref[...]
    h = h0_ref[...]                                                   # (1, 128) f32
    hs = []
    for t in range(T):                      # T is static -> fully unrolled
        gates = xi[t:t + 1, :] + jnp.dot(h.astype(jnp.bfloat16), wh,
                                         preferred_element_type=jnp.float32)
        r = jax.nn.sigmoid(gates[:, 0 * LANE:1 * LANE])
        z = jax.nn.sigmoid(gates[:, 1 * LANE:2 * LANE])
        nx = gates[:, 2 * LANE:3 * LANE]    # W_in x + b_in
        nh = gates[:, 3 * LANE:4 * LANE]    # W_hn h + b_hn
        n = jnp.tanh(nx + r * nh)
        h = (1.0 - z) * n + z * h           # padded lanes stay exactly 0
        hs.append(h)
    hout_ref[...] = h

    # ---- Batched output projection + log-softmax (one matmul, one store). ----
    # Padded vocab lanes get NEG_BIG from bout, so they are excluded from the
    # max and contribute exp(..) == 0 to the sum.
    # TODO(synk): for large vocab (V ~ 32k) tile Wout over lanes with an online
    # LSE instead of one resident (128, Vp) block (v7x VMEM planning).
    h_all = jnp.concatenate(hs, axis=0)                               # (T, 128) f32
    logits = (jnp.dot(h_all.astype(jnp.bfloat16), wout_ref[...],
                      preferred_element_type=jnp.float32)
              + bout_ref[...])                                        # (T, Vp) f32
    m = jnp.max(logits, axis=-1, keepdims=True)
    shifted = logits - m
    lse = jnp.log(jnp.sum(jnp.exp(shifted), axis=-1, keepdims=True))
    out_ref[...] = shifted - lse


# ---------------------------------------------------------------------------
# Wrapper: single pallas_call for the whole token sequence
# ---------------------------------------------------------------------------
def decoder_gru_forward(tokens, h0, packed):
    """tokens: (T,) int32; h0: (1,1,H). Returns (log_probs (T,V), h_final (1,1,H))."""
    T = tokens.shape[0]
    V = packed["emb"].shape[0]
    Vp = packed["wout"].shape[1]
    H = h0.shape[-1]

    h0_p = jnp.zeros((1, LANE), jnp.float32).at[0, :H].set(
        h0.reshape(-1).astype(jnp.float32))

    vmem = pl.BlockSpec(memory_space=pltpu.MemorySpace.VMEM)
    smem = pl.BlockSpec(memory_space=pltpu.MemorySpace.SMEM)

    out_pad, h_pad = pl.pallas_call(
        decoder_gru_kernel,
        out_shape=(
            jax.ShapeDtypeStruct((T, Vp), jnp.float32),   # per-step log-probs
            jax.ShapeDtypeStruct((1, LANE), jnp.float32), # final hidden
        ),
        in_specs=[smem, vmem, vmem, vmem, vmem, vmem, vmem, vmem],
        out_specs=(vmem, vmem),
        input_output_aliases={7: 1},   # h0 buffer reused for the final hidden state
    )(tokens.astype(jnp.int32), packed["emb"], packed["wi"], packed["wh"],
      packed["b"], packed["wout"], packed["bout"], h0_p)

    log_probs = out_pad[:, :V]
    h_final = h_pad[:, :H].reshape(1, 1, H)
    return log_probs, h_final


decoder_gru_forward = jax.jit(decoder_gru_forward)


# ---------------------------------------------------------------------------
# Parameters (PyTorch layouts) + packing into the fused/padded kernel layout
# ---------------------------------------------------------------------------
def make_params(key, output_size, hidden_size):
    H, E = hidden_size, EMB
    ks = jax.random.split(key, 7)
    s = 1.0 / jnp.sqrt(jnp.float32(H))
    u = lambda k, shape: jax.random.uniform(k, shape, jnp.float32, -s, s)
    return {
        "embedding": jax.random.normal(ks[0], (output_size, E), jnp.float32),
        "w_ih": u(ks[1], (3 * H, E)),   # [r, z, n] row blocks (nn.GRU layout)
        "w_hh": u(ks[2], (3 * H, H)),
        "b_ih": u(ks[3], (3 * H,)),
        "b_hh": u(ks[4], (3 * H,)),
        "w_out": u(ks[5], (output_size, H)),   # nn.Linear layout (V, H)
        "b_out": u(ks[6], (output_size,)),
    }


def pack_params(raw, hidden_size, output_size):
    H, V, E = hidden_size, output_size, EMB
    assert H <= LANE and E <= LANE, "this kernel assumes hidden/embed <= 128 lanes"
    Vp = pl.cdiv(V, LANE) * LANE
    G = LANE

    w_ih, w_hh = raw["w_ih"], raw["w_hh"]
    b_ih, b_hh = raw["b_ih"], raw["b_hh"]
    w_ir, w_iz, w_in = w_ih[:H], w_ih[H:2 * H], w_ih[2 * H:]
    w_hr, w_hz, w_hn = w_hh[:H], w_hh[H:2 * H], w_hh[2 * H:]

    wi = jnp.zeros((LANE, 4 * G), jnp.float32)
    wi = wi.at[:E, 0 * G:0 * G + H].set(w_ir.T)
    wi = wi.at[:E, 1 * G:1 * G + H].set(w_iz.T)
    wi = wi.at[:E, 2 * G:2 * G + H].set(w_in.T)

    wh = jnp.zeros((LANE, 4 * G), jnp.float32)
    wh = wh.at[:H, 0 * G:0 * G + H].set(w_hr.T)
    wh = wh.at[:H, 1 * G:1 * G + H].set(w_hz.T)
    wh = wh.at[:H, 3 * G:3 * G + H].set(w_hn.T)

    b = jnp.zeros((1, 4 * G), jnp.float32)
    b = b.at[0, 0 * G:0 * G + H].set(b_ih[:H] + b_hh[:H])
    b = b.at[0, 1 * G:1 * G + H].set(b_ih[H:2 * H] + b_hh[H:2 * H])
    b = b.at[0, 2 * G:2 * G + H].set(b_ih[2 * H:])
    b = b.at[0, 3 * G:3 * G + H].set(b_hh[2 * H:])

    wout = jnp.zeros((LANE, Vp), jnp.float32).at[:H, :V].set(raw["w_out"].T)
    bout = jnp.full((1, Vp), NEG_BIG, jnp.float32).at[0, :V].set(raw["b_out"])

    emb = jnp.zeros((V, 1, LANE), jnp.float32).at[:, 0, :E].set(raw["embedding"])

    return {
        "emb": emb,                            # f32 (gather + ReLU done in f32)
        "wi": wi.astype(jnp.bfloat16),         # bf16 weights, f32 MXU accumulation
        "wh": wh.astype(jnp.bfloat16),
        "b": b,                                # f32
        "wout": wout.astype(jnp.bfloat16),
        "bout": bout,                          # f32 (keeps NEG_BIG exact)
    }


# ---------------------------------------------------------------------------
# Pure-JAX reference (exactly the PyTorch module stepped per token, f32)
# ---------------------------------------------------------------------------
def reference_forward(tokens, h0, raw):
    H = h0.shape[-1]
    h = h0.reshape(1, H)
    outs = []
    for tok in tokens:
        x = jnp.maximum(raw["embedding"][tok].reshape(1, -1), 0.0)
        gi = x @ raw["w_ih"].T + raw["b_ih"]
        gh = h @ raw["w_hh"].T + raw["b_hh"]
        r = jax.nn.sigmoid(gi[:, :H] + gh[:, :H])
        z = jax.nn.sigmoid(gi[:, H:2 * H] + gh[:, H:2 * H])
        n = jnp.tanh(gi[:, 2 * H:] + r * gh[:, 2 * H:])
        h = (1.0 - z) * n + z * h
        logits = h @ raw["w_out"].T + raw["b_out"]
        outs.append(jax.nn.log_softmax(logits, axis=-1))
    return jnp.concatenate(outs, axis=0), h.reshape(1, 1, H)


if __name__ == "__main__":
    OUTPUT_SIZE = 64   # vocab size
    HIDDEN_SIZE = 32
    SEQ_LEN = 8

    key = jax.random.PRNGKey(0)
    k_params, k_tok = jax.random.split(key)
    raw = make_params(k_params, OUTPUT_SIZE, HIDDEN_SIZE)
    packed = pack_params(raw, HIDDEN_SIZE, OUTPUT_SIZE)

    tokens = jax.random.randint(k_tok, (SEQ_LEN,), 0, OUTPUT_SIZE, dtype=jnp.int32)
    h0 = jnp.zeros((1, 1, HIDDEN_SIZE), jnp.float32)   # init_hidden()

    log_probs, h_final = decoder_gru_forward(tokens, h0, packed)
    jax.block_until_ready((log_probs, h_final))

    assert log_probs.shape == (SEQ_LEN, OUTPUT_SIZE)
    assert h_final.shape == (1, 1, HIDDEN_SIZE)
    # each log-softmax row must sum to ~1 in prob space (computed in f32)
    assert jnp.allclose(jnp.sum(jnp.exp(log_probs), axis=-1), 1.0, atol=1e-3)

    ref_lp, ref_h = reference_forward(tokens, h0, raw)
    # bf16 matmul weights (f32 accumulation / f32 elementwise) -> slightly
    # looser tolerance than a pure-f32 kernel.
    assert jnp.allclose(log_probs, ref_lp, atol=1e-2, rtol=1e-2), float(
        jnp.max(jnp.abs(log_probs - ref_lp)))
    assert jnp.allclose(h_final, ref_h, atol=1e-2, rtol=1e-2), float(
        jnp.max(jnp.abs(h_final - ref_h)))

    print("KERNEL_OK")
</pallas_src>

<mosaic_0001>
module attributes {stable_mosaic.version = 11 : i64} {
  func.func @decoder_gru_kernel(%arg0: memref<8xi32, #tpu.memory_space<smem>>, %arg1: memref<64x1x128xf32, #tpu.memory_space<vmem>>, %arg2: memref<128x512xbf16, #tpu.memory_space<vmem>>, %arg3: memref<128x512xbf16, #tpu.memory_space<vmem>>, %arg4: memref<1x512xf32, #tpu.memory_space<vmem>>, %arg5: memref<128x128xbf16, #tpu.memory_space<vmem>>, %arg6: memref<1x128xf32, #tpu.memory_space<vmem>>, %arg7: memref<1x128xf32, #tpu.memory_space<vmem>>, %arg8: memref<8x128xf32, #tpu.memory_space<vmem>>, %arg9: memref<1x128xf32, #tpu.memory_space<vmem>>) attributes {dimension_semantics = [], scalar_prefetch = 0 : i64, scratch_operands = 0 : i64, tpu.core_type = #tpu.core_type<tc>} {
    %c0 = arith.constant 0 : index
    %0 = memref.load %arg0[%c0] : memref<8xi32, #tpu.memory_space<smem>>
    %1 = arith.index_cast %0 : i32 to index
    %c0_0 = arith.constant 0 : index
    %c0_1 = arith.constant 0 : index
    %2 = vector.load %arg1[%1, %c0_0, %c0_1] : memref<64x1x128xf32, #tpu.memory_space<vmem>>, vector<1x1x128xf32>
    %3 = vector.shape_cast %2 : vector<1x1x128xf32> to vector<1x128xf32>
    %cst = arith.constant 0.000000e+00 : f32
    %4 = vector.broadcast %cst : f32 to vector<1x128xf32>
    %5 = arith.maximumf %3, %4 : vector<1x128xf32>
    %c1 = arith.constant 1 : index
    %6 = memref.load %arg0[%c1] : memref<8xi32, #tpu.memory_space<smem>>
    %7 = arith.index_cast %6 : i32 to index
    %c0_2 = arith.constant 0 : index
    %c0_3 = arith.constant 0 : index
    %8 = vector.load %arg1[%7, %c0_2, %c0_3] : memref<64x1x128xf32, #tpu.memory_space<vmem>>, vector<1x1x128xf32>
    %9 = vector.shape_cast %8 : vector<1x1x128xf32> to vector<1x128xf32>
    %cst_4 = arith.constant 0.000000e+00 : f32
    %10 = vector.broadcast %cst_4 : f32 to vector<1x128xf32>
    %11 = arith.maximumf %9, %10 : vector<1x128xf32>
    %c2 = arith.constant 2 : index
    %12 = memref.load %arg0[%c2] : memref<8xi32, #tpu.memory_space<smem>>
    %13 = arith.index_cast %12 : i32 to index
    %c0_5 = arith.constant 0 : index
    %c0_6 = arith.constant 0 : index
    %14 = vector.load %arg1[%13, %c0_5, %c0_6] : memref<64x1x128xf32, #tpu.memory_space<vmem>>, vector<1x1x128xf32>
    %15 = vector.shape_cast %14 : vector<1x1x128xf32> to vector<1x128xf32>
    %cst_7 = arith.constant 0.000000e+00 : f32
    %16 = vector.broadcast %cst_7 : f32 to vector<1x128xf32>
    %17 = arith.maximumf %15, %16 : vector<1x128xf32>
    %c3 = arith.constant 3 : index
    %18 = memref.load %arg0[%c3] : memref<8xi32, #tpu.memory_space<smem>>
    %19 = arith.index_cast %18 : i32 to index
    %c0_8 = arith.constant 0 : index
    %c0_9 = arith.constant 0 : index
    %20 = vector.load %arg1[%19, %c0_8, %c0_9] : memref<64x1x128xf32, #tpu.memory_space<vmem>>, vector<1x1x128xf32>
    %21 = vector.shape_cast %20 : vector<1x1x128xf32> to vector<1x128xf32>
    %cst_10 = arith.constant 0.000000e+00 : f32
    %22 = vector.broadcast %cst_10 : f32 to vector<1x128xf32>
    %23 = arith.maximumf %21, %22 : vector<1x128xf32>
    %c4 = arith.constant 4 : index
    %24 = memref.load %arg0[%c4] : memref<8xi32, #tpu.memory_space<smem>>
    %25 = arith.index_cast %24 : i32 to index
    %c0_11 = arith.constant 0 : index
    %c0_12 = arith.constant 0 : index
    %26 = vector.load %arg1[%25, %c0_11, %c0_12] : memref<64x1x128xf32, #tpu.memory_space<vmem>>, vector<1x1x128xf32>
    %27 = vector.shape_cast %26 : vector<1x1x128xf32> to vector<1x128xf32>
    %cst_13 = arith.constant 0.000000e+00 : f32
    %28 = vector.broadcast %cst_13 : f32 to vector<1x128xf32>
    %29 = arith.maximumf %27, %28 : vector<1x128xf32>
    %c5 = arith.constant 5 : index
    %30 = memref.load %arg0[%c5] : memref<8xi32, #tpu.memory_space<smem>>
    %31 = arith.index_cast %30 : i32 to index
    %c0_14 = arith.constant 0 : index
    %c0_15 = arith.constant 0 : index
    %32 = vector.load %arg1[%31, %c0_14, %c0_15] : memref<64x1x128xf32, #tpu.memory_space<vmem>>, vector<1x1x128xf32>
    %33 = vector.shape_cast %32 : vector<1x1x128xf32> to vector<1x128xf32>
    %cst_16 = arith.constant 0.000000e+00 : f32
    %34 = vector.broadcast %cst_16 : f32 to vector<1x128xf32>
    %35 = arith.maximumf %33, %34 : vector<1x128xf32>
    %c6 = arith.constant 6 : index
    %36 = memref.load %arg0[%c6] : memref<8xi32, #tpu.memory_space<smem>>
    %37 = arith.index_cast %36 : i32 to index
    %c0_17 = arith.constant 0 : index
    %c0_18 = arith.constant 0 : index
    %38 = vector.load %arg1[%37, %c0_17, %c0_18] : memref<64x1x128xf32, #tpu.memory_space<vmem>>, vector<1x1x128xf32>
    %39 = vector.shape_cast %38 : vector<1x1x128xf32> to vector<1x128xf32>
    %cst_19 = arith.constant 0.000000e+00 : f32
    %40 = vector.broadcast %cst_19 : f32 to vector<1x128xf32>
    %41 = arith.maximumf %39, %40 : vector<1x128xf32>
    %c7 = arith.constant 7 : index
    %42 = memref.load %arg0[%c7] : memref<8xi32, #tpu.memory_space<smem>>
    %43 = arith.index_cast %42 : i32 to index
    %c0_20 = arith.constant 0 : index
    %c0_21 = arith.constant 0 : index
    %44 = vector.load %arg1[%43, %c0_20, %c0_21] : memref<64x1x128xf32, #tpu.memory_space<vmem>>, vector<1x1x128xf32>
    %45 = vector.shape_cast %44 : vector<1x1x128xf32> to vector<1x128xf32>
    %cst_22 = arith.constant 0.000000e+00 : f32
    %46 = vector.broadcast %cst_22 : f32 to vector<1x128xf32>
    %47 = arith.maximumf %45, %46 : vector<1x128xf32>
    %48 = tpu.concatenate %5, %11, %17, %23, %29, %35, %41, %47 in 0 : vector<1x128xf32>, vector<1x128xf32>, vector<1x128xf32>, vector<1x128xf32>, vector<1x128xf32>, vector<1x128xf32>, vector<1x128xf32>, vector<1x128xf32> -> vector<8x128xf32>
    %49 = arith.truncf %48 : vector<8x128xf32> to vector<8x128xbf16>
    %c0_23 = arith.constant 0 : index
    %c0_24 = arith.constant 0 : index
    %50 = vector.load %arg2[%c0_23, %c0_24] : memref<128x512xbf16, #tpu.memory_space<vmem>>, vector<128x512xbf16>
    %cst_25 = arith.constant dense<0.000000e+00> : vector<8x512xf32>
    %51 = tpu.matmul %49, %50, %cst_25 {dimension_numbers = #tpu.dot_dimension_numbers<[1], [0], [0], [1], [0, 0, 1, 1], [], []>} : vector<8x128xbf16>, vector<128x512xbf16>, vector<8x512xf32> -> vector<8x512xf32>
    %c0_26 = arith.constant 0 : index
    %c0_27 = arith.constant 0 : index
    %52 = vector.load %arg4[%c0_26, %c0_27] : memref<1x512xf32, #tpu.memory_space<vmem>>, vector<1x512xf32>
    %53 = vector.broadcast %52 : vector<1x512xf32> to vector<8x512xf32>
    %54 = arith.addf %51, %53 : vector<8x512xf32>
    %c0_28 = arith.constant 0 : index
    %c0_29 = arith.constant 0 : index
    %55 = vector.load %arg3[%c0_28, %c0_29] : memref<128x512xbf16, #tpu.memory_space<vmem>>, vector<128x512xbf16>
    %c0_30 = arith.constant 0 : index
    %c0_31 = arith.constant 0 : index
    %56 = vector.load %arg7[%c0_30, %c0_31] : memref<1x128xf32, #tpu.memory_space<vmem>>, vector<1x128xf32>
    %57 = vector.extract_strided_slice %54 {offsets = [0, 0], sizes = [1, 512], strides = [1, 1]} : vector<8x512xf32> to vector<1x512xf32>
    %58 = arith.truncf %56 : vector<1x128xf32> to vector<1x128xbf16>
    %cst_32 = arith.constant dense<0.000000e+00> : vector<1x512xf32>
    %59 = tpu.matmul %58, %55, %cst_32 {dimension_numbers = #tpu.dot_dimension_numbers<[1], [0], [0], [1], [0, 0, 1, 1], [], []>} : vector<1x128xbf16>, vector<128x512xbf16>, vector<1x512xf32> -> vector<1x512xf32>
    %60 = arith.addf %57, %59 : vector<1x512xf32>
    %61 = vector.extract_strided_slice %60 {offsets = [0, 0], sizes = [1, 128], strides = [1, 1]} : vector<1x512xf32> to vector<1x128xf32>
    %62 = arith.negf %61 : vector<1x128xf32>
    %63 = math.exp %62 : vector<1x128xf32>
    %cst_33 = arith.constant 1.000000e+00 : f32
    %64 = vector.broadcast %cst_33 : f32 to vector<1x128xf32>
    %65 = arith.addf %64, %63 : vector<1x128xf32>
    %66 = arith.divf %64, %65 : vector<1x128xf32>
    %67 = vector.extract_strided_slice %60 {offsets = [0, 128], sizes = [1, 128], strides = [1, 1]} : vector<1x512xf32> to vector<1x128xf32>
    %68 = arith.negf %67 : vector<1x128xf32>
    %69 = math.exp %68 : vector<1x128xf32>
    %cst_34 = arith.constant 1.000000e+00 : f32
    %70 = vector.broadcast %cst_34 : f32 to vector<1x128xf32>
    %71 = arith.addf %70, %69 : vector<1x128xf32>
    %72 = arith.divf %70, %71 : vector<1x128xf32>
    %73 = vector.extract_strided_slice %60 {offsets = [0, 256], sizes = [1, 128], strides = [1, 1]} : vector<1x512xf32> to vector<1x128xf32>
    %74 = vector.extract_strided_slice %60 {offsets = [0, 384], sizes = [1, 128], strides = [1, 1]} : vector<1x512xf32> to vector<1x128xf32>
    %75 = arith.mulf %66, %74 : vector<1x128xf32>
    %76 = arith.addf %73, %75 : vector<1x128xf32>
    %77 = math.tanh %76 : vector<1x128xf32>
    %cst_35 = arith.constant 1.000000e+00 : f32
    %78 = vector.broadcast %cst_35 : f32 to vector<1x128xf32>
    %79 = arith.subf %78, %72 : vector<1x128xf32>
    %80 = arith.mulf %79, %77 : vector<1x128xf32>
    %81 = arith.mulf %72, %56 : vector<1x128xf32>
    %82 = arith.addf %80, %81 : vector<1x128xf32>
    %83 = vector.extract_strided_slice %54 {offsets = [1, 0], sizes = [1, 512], strides = [1, 1]} : vector<8x512xf32> to vector<1x512xf32>
    %84 = arith.truncf %82 : vector<1x128xf32> to vector<1x128xbf16>
    %cst_36 = arith.constant dense<0.000000e+00> : vector<1x512xf32>
    %85 = tpu.matmul %84, %55, %cst_36 {dimension_numbers = #tpu.dot_dimension_numbers<[1], [0], [0], [1], [0, 0, 1, 1], [], []>} : vector<1x128xbf16>, vector<128x512xbf16>, vector<1x512xf32> -> vector<1x512xf32>
    %86 = arith.addf %83, %85 : vector<1x512xf32>
    %87 = vector.extract_strided_slice %86 {offsets = [0, 0], sizes = [1, 128], strides = [1, 1]} : vector<1x512xf32> to vector<1x128xf32>
    %88 = arith.negf %87 : vector<1x128xf32>
    %89 = math.exp %88 : vector<1x128xf32>
    %cst_37 = arith.constant 1.000000e+00 : f32
    %90 = vector.broadcast %cst_37 : f32 to vector<1x128xf32>
    %91 = arith.addf %90, %89 : vector<1x128xf32>
    %92 = arith.divf %90, %91 : vector<1x128xf32>
    %93 = vector.extract_strided_slice %86 {offsets = [0, 128], sizes = [1, 128], strides = [1, 1]} : vector<1x512xf32> to vector<1x128xf32>
    %94 = arith.negf %93 : vector<1x128xf32>
    %95 = math.exp %94 : vector<1x128xf32>
    %cst_38 = arith.constant 1.000000e+00 : f32
    %96 = vector.broadcast %cst_38 : f32 to vector<1x128xf32>
    %97 = arith.addf %96, %95 : vector<1x128xf32>
    %98 = arith.divf %96, %97 : vector<1x128xf32>
    %99 = vector.extract_strided_slice %86 {offsets = [0, 256], sizes = [1, 128], strides = [1, 1]} : vector<1x512xf32> to vector<1x128xf32>
    %100 = vector.extract_strided_slice %86 {offsets = [0, 384], sizes = [1, 128], strides = [1, 1]} : vector<1x512xf32> to vector<1x128xf32>
    %101 = arith.mulf %92, %100 : vector<1x128xf32>
    %102 = arith.addf %99, %101 : vector<1x128xf32>
    %103 = math.tanh %102 : vector<1x128xf32>
    %cst_39 = arith.constant 1.000000e+00 : f32
    %104 = vector.broadcast %cst_39 : f32 to vector<1x128xf32>
    %105 = arith.subf %104, %98 : vector<1x128xf32>
    %106 = arith.mulf %105, %103 : vector<1x128xf32>
    %107 = arith.mulf %98, %82 : vector<1x128xf32>
    %108 = arith.addf %106, %107 : vector<1x128xf32>
    %109 = vector.extract_strided_slice %54 {offsets = [2, 0], sizes = [1, 512], strides = [1, 1]} : vector<8x512xf32> to vector<1x512xf32>
    %110 = arith.truncf %108 : vector<1x128xf32> to vector<1x128xbf16>
    %cst_40 = arith.constant dense<0.000000e+00> : vector<1x512xf32>
    %111 = tpu.matmul %110, %55, %cst_40 {dimension_numbers = #tpu.dot_dimension_numbers<[1], [0], [0], [1], [0, 0, 1, 1], [], []>} : vector<1x128xbf16>, vector<128x512xbf16>, vector<1x512xf32> -> vector<1x512xf32>
    %112 = arith.addf %109, %111 : vector<1x512xf32>
    %113 = vector.extract_strided_slice %112 {offsets = [0, 0], sizes = [1, 128], strides = [1, 1]} : vector<1x512xf32> to vector<1x128xf32>
    %114 = arith.negf %113 : vector<1x128xf32>
    %115 = math.exp %114 : vector<1x128xf32>
    %cst_41 = arith.constant 1.000000e+00 : f32
    %116 = vector.broadcast %cst_41 : f32 to vector<1x128xf32>
    %117 = arith.addf %116, %115 : vector<1x128xf32>
    %118 = arith.divf %116, %117 : vector<1x128xf32>
    %119 = vector.extract_strided_slice %112 {offsets = [0, 128], sizes = [1, 128], strides = [1, 1]} : vector<1x512xf32> to vector<1x128xf32>
    %120 = arith.negf %119 : vector<1x128xf32>
    %121 = math.exp %120 : vector<1x128xf32>
    %cst_42 = arith.constant 1.000000e+00 : f32
    %122 = vector.broadcast %cst_42 : f32 to vector<1x128xf32>
    %123 = arith.addf %122, %121 : vector<1x128xf32>
    %124 = arith.divf %122, %123 : vector<1x128xf32>
    %125 = vector.extract_strided_slice %112 {offsets = [0, 256], sizes = [1, 128], strides = [1, 1]} : vector<1x512xf32> to vector<1x128xf32>
    %126 = vector.extract_strided_slice %112 {offsets = [0, 384], sizes = [1, 128], strides = [1, 1]} : vector<1x512xf32> to vector<1x128xf32>
    %127 = arith.mulf %118, %126 : vector<1x128xf32>
    %128 = arith.addf %125, %127 : vector<1x128xf32>
    %129 = math.tanh %128 : vector<1x128xf32>
    %cst_43 = arith.constant 1.000000e+00 : f32
    %130 = vector.broadcast %cst_43 : f32 to vector<1x128xf32>
    %131 = arith.subf %130, %124 : vector<1x128xf32>
    %132 = arith.mulf %131, %129 : vector<1x128xf32>
    %133 = arith.mulf %124, %108 : vector<1x128xf32>
    %134 = arith.addf %132, %133 : vector<1x128xf32>
    %135 = vector.extract_strided_slice %54 {offsets = [3, 0], sizes = [1, 512], strides = [1, 1]} : vector<8x512xf32> to vector<1x512xf32>
    %136 = arith.truncf %134 : vector<1x128xf32> to vector<1x128xbf16>
    %cst_44 = arith.constant dense<0.000000e+00> : vector<1x512xf32>
    %137 = tpu.matmul %136, %55, %cst_44 {dimension_numbers = #tpu.dot_dimension_numbers<[1], [0], [0], [1], [0, 0, 1, 1], [], []>} : vector<1x128xbf16>, vector<128x512xbf16>, vector<1x512xf32> -> vector<1x512xf32>
    %138 = arith.addf %135, %137 : vector<1x512xf32>
    %139 = vector.extract_strided_slice %138 {offsets = [0, 0], sizes = [1, 128], strides = [1, 1]} : vector<1x512xf32> to vector<1x128xf32>
    %140 = arith.negf %139 : vector<1x128xf32>
    %141 = math.exp %140 : vector<1x128xf32>
    %cst_45 = arith.constant 1.000000e+00 : f32
    %142 = vector.broadcast %cst_45 : f32 to vector<1x128xf32>
    %143 = arith.addf %142, %141 : vector<1x128xf32>
    %144 = arith.divf %142, %143 : vector<1x128xf32>
    %145 = vector.extract_strided_slice %138 {offsets = [0, 128], sizes = [1, 128], strides = [1, 1]} : vector<1x512xf32> to vector<1x128xf32>
    %146 = arith.negf %145 : vector<1x128xf32>
    %147 = math.exp %146 : vector<1x128xf32>
    %cst_46 = arith.constant 1.000000e+00 : f32
    %148 = vector.broadcast %cst_46 : f32 to vector<1x128xf32>
    %149 = arith.addf %148, %147 : vector<1x128xf32>
    %150 = arith.divf %148, %149 : vector<1x128xf32>
    %151 = vector.extract_strided_slice %138 {offsets = [0, 256], sizes = [1, 128], strides = [1, 1]} : vector<1x512xf32> to vector<1x128xf32>
    %152 = vector.extract_strided_slice %138 {offsets = [0, 384], sizes = [1, 128], strides = [1, 1]} : vector<1x512xf32> to vector<1x128xf32>
    %153 = arith.mulf %144, %152 : vector<1x128xf32>
    %154 = arith.addf %151, %153 : vector<1x128xf32>
    %155 = math.tanh %154 : vector<1x128xf32>
    %cst_47 = arith.constant 1.000000e+00 : f32
    %156 = vector.broadcast %cst_47 : f32 to vector<1x128xf32>
    %157 = arith.subf %156, %150 : vector<1x128xf32>
    %158 = arith.mulf %157, %155 : vector<1x128xf32>
    %159 = arith.mulf %150, %134 : vector<1x128xf32>
    %160 = arith.addf %158, %159 : vector<1x128xf32>
    %161 = vector.extract_strided_slice %54 {offsets = [4, 0], sizes = [1, 512], strides = [1, 1]} : vector<8x512xf32> to vector<1x512xf32>
    %162 = arith.truncf %160 : vector<1x128xf32> to vector<1x128xbf16>
    %cst_48 = arith.constant dense<0.000000e+00> : vector<1x512xf32>
    %163 = tpu.matmul %162, %55, %cst_48 {dimension_numbers = #tpu.dot_dimension_numbers<[1], [0], [0], [1], [0, 0, 1, 1], [], []>} : vector<1x128xbf16>, vector<128x512xbf16>, vector<1x512xf32> -> vector<1x512xf32>
    %164 = arith.addf %161, %163 : vector<1x512xf32>
    %165 = vector.extract_strided_slice %164 {offsets = [0, 0], sizes = [1, 128], strides = [1, 1]} : vector<1x512xf32> to vector<1x128xf32>
    %166 = arith.negf %165 : vector<1x128xf32>
    %167 = math.exp %166 : vector<1x128xf32>
    %cst_49 = arith.constant 1.000000e+00 : f32
    %168 = vector.broadcast %cst_49 : f32 to vector<1x128xf32>
    %169 = arith.addf %168, %167 : vector<1x128xf32>
    %170 = arith.divf %168, %169 : vector<1x128xf32>
    %171 = vector.extract_strided_slice %164 {offsets = [0, 128], sizes = [1, 128], strides = [1, 1]} : vector<1x512xf32> to vector<1x128xf32>
    %172 = arith.negf %171 : vector<1x128xf32>
    %173 = math.exp %172 : vector<1x128xf32>
    %cst_50 = arith.constant 1.000000e+00 : f32
    %174 = vector.broadcast %cst_50 : f32 to vector<1x128xf32>
    %175 = arith.addf %174, %173 : vector<1x128xf32>
    %176 = arith.divf %174, %175 : vector<1x128xf32>
    %177 = vector.extract_strided_slice %164 {offsets = [0, 256], sizes = [1, 128], strides = [1, 1]} : vector<1x512xf32> to vector<1x128xf32>
    %178 = vector.extract_strided_slice %164 {offsets = [0, 384], sizes = [1, 128], strides = [1, 1]} : vector<1x512xf32> to vector<1x128xf32>
    %179 = arith.mulf %170, %178 : vector<1x128xf32>
    %180 = arith.addf %177, %179 : vector<1x128xf32>
    %181 = math.tanh %180 : vector<1x128xf32>
    %cst_51 = arith.constant 1.000000e+00 : f32
    %182 = vector.broadcast %cst_51 : f32 to vector<1x128xf32>
    %183 = arith.subf %182, %176 : vector<1x128xf32>
    %184 = arith.mulf %183, %181 : vector<1x128xf32>
    %185 = arith.mulf %176, %160 : vector<1x128xf32>
    %186 = arith.addf %184, %185 : vector<1x128xf32>
    %187 = vector.extract_strided_slice %54 {offsets = [5, 0], sizes = [1, 512], strides = [1, 1]} : vector<8x512xf32> to vector<1x512xf32>
    %188 = arith.truncf %186 : vector<1x128xf32> to vector<1x128xbf16>
    %cst_52 = arith.constant dense<0.000000e+00> : vector<1x512xf32>
    %189 = tpu.matmul %188, %55, %cst_52 {dimension_numbers = #tpu.dot_dimension_numbers<[1], [0], [0], [1], [0, 0, 1, 1], [], []>} : vector<1x128xbf16>, vector<128x512xbf16>, vector<1x512xf32> -> vector<1x512xf32>
    %190 = arith.addf %187, %189 : vector<1x512xf32>
    %191 = vector.extract_strided_slice %190 {offsets = [0, 0], sizes = [1, 128], strides = [1, 1]} : vector<1x512xf32> to vector<1x128xf32>
    %192 = arith.negf %191 : vector<1x128xf32>
    %193 = math.exp %192 : vector<1x128xf32>
    %cst_53 = arith.constant 1.000000e+00 : f32
    %194 = vector.broadcast %cst_53 : f32 to vector<1x128xf32>
    %195 = arith.addf %194, %193 : vector<1x128xf32>
    %196 = arith.divf %194, %195 : vector<1x128xf32>
    %197 = vector.extract_strided_slice %190 {offsets = [0, 128], sizes = [1, 128], strides = [1, 1]} : vector<1x512xf32> to vector<1x128xf32>
    %198 = arith.negf %197 : vector<1x128xf32>
    %199 = math.exp %198 : vector<1x128xf32>
    %cst_54 = arith.constant 1.000000e+00 : f32
    %200 = vector.broadcast %cst_54 : f32 to vector<1x128xf32>
    %201 = arith.addf %200, %199 : vector<1x128xf32>
    %202 = arith.divf %200, %201 : vector<1x128xf32>
    %203 = vector.extract_strided_slice %190 {offsets = [0, 256], sizes = [1, 128], strides = [1, 1]} : vector<1x512xf32> to vector<1x128xf32>
    %204 = vector.extract_strided_slice %190 {offsets = [0, 384], sizes = [1, 128], strides = [1, 1]} : vector<1x512xf32> to vector<1x128xf32>
    %205 = arith.mulf %196, %204 : vector<1x128xf32>
    %206 = arith.addf %203, %205 : vector<1x128xf32>
    %207 = math.tanh %206 : vector<1x128xf32>
    %cst_55 = arith.constant 1.000000e+00 : f32
    %208 = vector.broadcast %cst_55 : f32 to vector<1x128xf32>
    %209 = arith.subf %208, %202 : vector<1x128xf32>
    %210 = arith.mulf %209, %207 : vector<1x128xf32>
    %211 = arith.mulf %202, %186 : vector<1x128xf32>
    %212 = arith.addf %210, %211 : vector<1x128xf32>
    %213 = vector.extract_strided_slice %54 {offsets = [6, 0], sizes = [1, 512], strides = [1, 1]} : vector<8x512xf32> to vector<1x512xf32>
    %214 = arith.truncf %212 : vector<1x128xf32> to vector<1x128xbf16>
    %cst_56 = arith.constant dense<0.000000e+00> : vector<1x512xf32>
    %215 = tpu.matmul %214, %55, %cst_56 {dimension_numbers = #tpu.dot_dimension_numbers<[1], [0], [0], [1], [0, 0, 1, 1], [], []>} : vector<1x128xbf16>, vector<128x512xbf16>, vector<1x512xf32> -> vector<1x512xf32>
    %216 = arith.addf %213, %215 : vector<1x512xf32>
    %217 = vector.extract_strided_slice %216 {offsets = [0, 0], sizes = [1, 128], strides = [1, 1]} : vector<1x512xf32> to vector<1x128xf32>
    %218 = arith.negf %217 : vector<1x128xf32>
    %219 = math.exp %218 : vector<1x128xf32>
    %cst_57 = arith.constant 1.000000e+00 : f32
    %220 = vector.broadcast %cst_57 : f32 to vector<1x128xf32>
    %221 = arith.addf %220, %219 : vector<1x128xf32>
    %222 = arith.divf %220, %221 : vector<1x128xf32>
    %223 = vector.extract_strided_slice %216 {offsets = [0, 128], sizes = [1, 128], strides = [1, 1]} : vector<1x512xf32> to vector<1x128xf32>
    %224 = arith.negf %223 : vector<1x128xf32>
    %225 = math.exp %224 : vector<1x128xf32>
    %cst_58 = arith.constant 1.000000e+00 : f32
    %226 = vector.broadcast %cst_58 : f32 to vector<1x128xf32>
    %227 = arith.addf %226, %225 : vector<1x128xf32>
    %228 = arith.divf %226, %227 : vector<1x128xf32>
    %229 = vector.extract_strided_slice %216 {offsets = [0, 256], sizes = [1, 128], strides = [1, 1]} : vector<1x512xf32> to vector<1x128xf32>
    %230 = vector.extract_strided_slice %216 {offsets = [0, 384], sizes = [1, 128], strides = [1, 1]} : vector<1x512xf32> to vector<1x128xf32>
    %231 = arith.mulf %222, %230 : vector<1x128xf32>
    %232 = arith.addf %229, %231 : vector<1x128xf32>
    %233 = math.tanh %232 : vector<1x128xf32>
    %cst_59 = arith.constant 1.000000e+00 : f32
    %234 = vector.broadcast %cst_59 : f32 to vector<1x128xf32>
    %235 = arith.subf %234, %228 : vector<1x128xf32>
    %236 = arith.mulf %235, %233 : vector<1x128xf32>
    %237 = arith.mulf %228, %212 : vector<1x128xf32>
    %238 = arith.addf %236, %237 : vector<1x128xf32>
    %239 = vector.extract_strided_slice %54 {offsets = [7, 0], sizes = [1, 512], strides = [1, 1]} : vector<8x512xf32> to vector<1x512xf32>
    %240 = arith.truncf %238 : vector<1x128xf32> to vector<1x128xbf16>
    %cst_60 = arith.constant dense<0.000000e+00> : vector<1x512xf32>
    %241 = tpu.matmul %240, %55, %cst_60 {dimension_numbers = #tpu.dot_dimension_numbers<[1], [0], [0], [1], [0, 0, 1, 1], [], []>} : vector<1x128xbf16>, vector<128x512xbf16>, vector<1x512xf32> -> vector<1x512xf32>
    %242 = arith.addf %239, %241 : vector<1x512xf32>
    %243 = vector.extract_strided_slice %242 {offsets = [0, 0], sizes = [1, 128], strides = [1, 1]} : vector<1x512xf32> to vector<1x128xf32>
    %244 = arith.negf %243 : vector<1x128xf32>
    %245 = math.exp %244 : vector<1x128xf32>
    %cst_61 = arith.constant 1.000000e+00 : f32
    %246 = vector.broadcast %cst_61 : f32 to vector<1x128xf32>
    %247 = arith.addf %246, %245 : vector<1x128xf32>
    %248 = arith.divf %246, %247 : vector<1x128xf32>
    %249 = vector.extract_strided_slice %242 {offsets = [0, 128], sizes = [1, 128], strides = [1, 1]} : vector<1x512xf32> to vector<1x128xf32>
    %250 = arith.negf %249 : vector<1x128xf32>
    %251 = math.exp %250 : vector<1x128xf32>
    %cst_62 = arith.constant 1.000000e+00 : f32
    %252 = vector.broadcast %cst_62 : f32 to vector<1x128xf32>
    %253 = arith.addf %252, %251 : vector<1x128xf32>
    %254 = arith.divf %252, %253 : vector<1x128xf32>
    %255 = vector.extract_strided_slice %242 {offsets = [0, 256], sizes = [1, 128], strides = [1, 1]} : vector<1x512xf32> to vector<1x128xf32>
    %256 = vector.extract_strided_slice %242 {offsets = [0, 384], sizes = [1, 128], strides = [1, 1]} : vector<1x512xf32> to vector<1x128xf32>
    %257 = arith.mulf %248, %256 : vector<1x128xf32>
    %258 = arith.addf %255, %257 : vector<1x128xf32>
    %259 = math.tanh %258 : vector<1x128xf32>
    %cst_63 = arith.constant 1.000000e+00 : f32
    %260 = vector.broadcast %cst_63 : f32 to vector<1x128xf32>
    %261 = arith.subf %260, %254 : vector<1x128xf32>
    %262 = arith.mulf %261, %259 : vector<1x128xf32>
    %263 = arith.mulf %254, %238 : vector<1x128xf32>
    %264 = arith.addf %262, %263 : vector<1x128xf32>
    %c0_64 = arith.constant 0 : index
    %c0_65 = arith.constant 0 : index
    %265 = vector.load %arg9[%c0_64, %c0_65] : memref<1x128xf32, #tpu.memory_space<vmem>>, vector<1x128xf32>
    tpu.vector_store %arg9[%c0_64, %c0_65], %264 {strides = array<i32>} : memref<1x128xf32, #tpu.memory_space<vmem>>, vector<1x128xf32>,
    %266 = tpu.concatenate %82, %108, %134, %160, %186, %212, %238, %264 in 0 : vector<1x128xf32>, vector<1x128xf32>, vector<1x128xf32>, vector<1x128xf32>, vector<1x128xf32>, vector<1x128xf32>, vector<1x128xf32>, vector<1x128xf32> -> vector<8x128xf32>
    %267 = arith.truncf %266 : vector<8x128xf32> to vector<8x128xbf16>
    %c0_66 = arith.constant 0 : index
    %c0_67 = arith.constant 0 : index
    %268 = vector.load %arg5[%c0_66, %c0_67] : memref<128x128xbf16, #tpu.memory_space<vmem>>, vector<128x128xbf16>
    %cst_68 = arith.constant dense<0.000000e+00> : vector<8x128xf32>
    %269 = tpu.matmul %267, %268, %cst_68 {dimension_numbers = #tpu.dot_dimension_numbers<[1], [0], [0], [1], [0, 0, 1, 1], [], []>} : vector<8x128xbf16>, vector<128x128xbf16>, vector<8x128xf32> -> vector<8x128xf32>
    %c0_69 = arith.constant 0 : index
    %c0_70 = arith.constant 0 : index
    %270 = vector.load %arg6[%c0_69, %c0_70] : memref<1x128xf32, #tpu.memory_space<vmem>>, vector<1x128xf32>
    %271 = vector.broadcast %270 : vector<1x128xf32> to vector<8x128xf32>
    %272 = arith.addf %269, %271 : vector<8x128xf32>
    %cst_71 = arith.constant dense<0xFF800000> : vector<8xf32>
    %273 = vector.multi_reduction <maximumf>, %272, %cst_71 [1] : vector<8x128xf32> to vector<8xf32>
    %274 = vector.shape_cast %273 : vector<8xf32> to vector<8x1xf32>
    %275 = vector.broadcast %274 : vector<8x1xf32> to vector<8x128xf32>
    %276 = arith.subf %272, %275 : vector<8x128xf32>
    %277 = math.exp %276 : vector<8x128xf32>
    %cst_72 = arith.constant dense<0.000000e+00> : vector<8xf32>
    %278 = vector.multi_reduction <add>, %277, %cst_72 [1] : vector<8x128xf32> to vector<8xf32>
    %279 = vector.shape_cast %278 : vector<8xf32> to vector<8x1xf32>
    %280 = math.log %279 : vector<8x1xf32>
    %281 = vector.broadcast %280 : vector<8x1xf32> to vector<8x128xf32>
    %282 = arith.subf %276, %281 : vector<8x128xf32>
    %c0_73 = arith.constant 0 : index
    %c0_74 = arith.constant 0 : index
    %283 = vector.load %arg8[%c0_73, %c0_74] : memref<8x128xf32, #tpu.memory_space<vmem>>, vector<8x128xf32>
    tpu.vector_store %arg8[%c0_73, %c0_74], %282 {strides = array<i32>} : memref<8x128xf32, #tpu.memory_space<vmem>>, vector<8x128xf32>,
    return
  }
}

</mosaic_0001>

<bundles_post_ra>
// kernel: decoder_gru_forward.1
= control target key start
LH: loop header
LB: loop body
LE: loop exit
PB: predicated region body
PF: predicated region fallthrough
CT: control target
= control target key end

     0   :  { %15 = vsyncpa [#allocation5], 0  ;;  %s2872_s0 = inlined_call_operand.vmem [shape: s32[8], index: 0, kind: input, shape index: {}]   ;;  %s2873_s1 = inlined_call_operand.hbm [shape: f32[64,1,128], index: 1, kind: input, shape index: {}]   ;;  %s2874_s2 = inlined_call_operand.hbm [shape: bf16[128,512], index: 2, kind: input, shape index: {}]   ;;  %s2875_s3 = inlined_call_operand.hbm [shape: bf16[128,512], index: 3, kind: input, shape index: {}]   ;;  %s2876_s4 = inlined_call_operand.vmem [shape: f32[1,512], index: 4, kind: input, shape index: {}]   ;;  %s2877_s5 = inlined_call_operand.hbm [shape: bf16[128,128], index: 5, kind: input, shape index: {}]   ;;  %s2878_s6 = inlined_call_operand.vmem [shape: f32[1,128], index: 6, kind: input, shape index: {}]   ;;  %s2879_s7 = inlined_call_operand.vmem [shape: f32[1,128], index: 7, kind: input, shape index: {}, may-alias: {7,9}]   ;;  %s2880_s8 = inlined_call_operand.hbm [shape: f32[8,128], index: 8, kind: output, shape index: {0}]   ;;  %s2881_s9 = inlined_call_operand.vmem [shape: f32[1,128], index: 9, kind: output, shape index: {1}, may-alias: {7,9}]  }
   0x1   :  { %16 = vsyncpa [#allocation3], 0 }
   0x2   :  { %17 = vsyncpa [#allocation8], 0 }
   0x3   :  { %18 = vsyncpa [#allocation11], 0  ;;  %s46_s11 = sshll.u32 %s2874_s2, 4  ;;  %s47_s11 = int_to_ptr.hbm [resolvable:$true] %s46_s11 }
   0x4   :  { %19 = vsyncpa [#allocation4], 0  ;;  %s2321_s12 = smov [#allocation7]   ;;  %s25_s16 = sshll.u32 %s2872_s0, 4  ;;  %s26_s16 = int_to_ptr.vmem [resolvable:$true] %s25_s16 }
   0x5   :  { %s48_s13 = sshll.u32 %s2321_s12, 4  ;;  %s2322_s17 = smov 256   ;;  %s49_s13 = int_to_ptr.vmem [resolvable:$true] %s48_s13 }
   0x6   :  { %s2323_s18 = smov 16   ;;  %s2324_s19 = smov [#allocation2]  }
   0x7   :  { %54 = dma.hbm_to_vmem [thread:$0]  %s47_s11, 4096, %s49_s13, [#allocation8], %s2322_s17, %s2322_s17, %s2323_s18  }
   0x8   :  { %28 = dma.vmem_to_smem %s26_s16, 16, %s2324_s19, [#allocation5]  }
   0x9   :  { %s33_s22 = sshll.u32 %s2873_s1, 4  ;;  %s2325_s2 = smov [#allocation6]   ;;  %s34_s22 = int_to_ptr.hbm [resolvable:$true] %s33_s22 }
   0xa   :  { %s35_s23 = sshll.u32 %s2325_s2, 4  ;;  %s2326_s24 = smov 1   ;;  %s36_s23 = int_to_ptr.vmem [resolvable:$true] %s35_s23 }
   0xb   :  { %41 = dma.hbm_to_vmem [thread:$0]  %s34_s22, 1024, %s36_s23, [#allocation3], %s2323_s18, %s2323_s18, %s2326_s24  }
   0xc   :  { %s59_s0 = sshll.u32 %s2875_s3, 4  ;;  %s2327_s27 = smov [#allocation9]   ;;  %s60_s0 = int_to_ptr.hbm [resolvable:$true] %s59_s0 }
   0xd   :  { %s61_s28 = sshll.u32 %s2327_s27, 4  ;;  %s74_s10 = sshll.u32 %s2877_s5, 4  ;;  %s62_s28 = int_to_ptr.vmem [resolvable:$true] %s61_s28  ;;  %s75_s10 = int_to_ptr.hbm [resolvable:$true] %s74_s10 }
   0xe   :  { %67 = dma.hbm_to_vmem [thread:$0]  %s60_s0, 4096, %s62_s28, [#allocation8], %s2322_s17, %s2322_s17, %s2323_s18  }
   0xf   :  { %s2328_s1 = smov [#allocation10]   ;;  %s2329_s12 = smov 64  }
  0x10   :  { %s76_s11 = sshll.u32 %s2328_s1, 4  ;;  %s2330_s13 = smov 4   ;;  %s77_s11 = int_to_ptr.vmem [resolvable:$true] %s76_s11 }
  0x11   :  { %82 = dma.hbm_to_vmem [thread:$0]  %s75_s10, 1024, %s77_s11, [#allocation11], %s2329_s12, %s2329_s12, %s2330_s13  }
  0x12   :  { %2311 = dma.done.wait [#allocation5], 16  }
  0x13   :  { %2312 = vsyncadd [#allocation5], 4294967280 }
  0x14   :  { %2313 = dma.done.wait [#allocation3], 1024  }
  0x15   :  { %2314 = vsyncadd [#allocation3], 4294966272 }
  0x16   :  { %2315 = dma.done.wait [#allocation8], 8192  }
  0x17   :  { %2316 = vsyncadd [#allocation8], 4294959104 }
  0x18   :  { %2317 = dma.done.wait [#allocation11], 1024  }
  0x19   :  { %2318 = vsyncadd [#allocation11], 4294966272 }
  0x1a   :  { %107 = sfence }
  0x1b   :  { %v1821_v0 = vld [vmem:[#allocation7 + $0xe0] sm:$0xf]  ;;  %v2041_v1 = vld [vmem:[#allocation7 + $0xec] sm:$0xf0]  ;;  %v2039_v2 = vld [vmem:[#allocation7 + $0xe4] sm:$0xf] }
  0x1c   :  { %v1822_v3 = vor.u32 %v2041_v1, %v1821_v0  ;;  %v1823_v4 = vld [vmem:[#allocation7 + $0xf0] sm:$0xf0]  ;;  %v1805_v5 = vld [vmem:[#allocation7 + $0xc0] sm:$0xf]  ;;  %v2037_v6 = vld [vmem:[#allocation7 + $0xcc] sm:$0xf0] }
  0x1d   :  { %v1826_v7 = vor.u32 %v2039_v2, %v1823_v4  ;;  %v2035_v8 = vld [vmem:[#allocation7 + $0xc4] sm:$0xf]  ;;  %v1807_v9 = vld [vmem:[#allocation7 + $0xd0] sm:$0xf0]  ;;  %v1806_v10 = vor.u32 %v2037_v6, %v1805_v5  ;;  %v1789_v11 = vld [vmem:[#allocation7 + $0xa0] sm:$0xf] }
  0x1e   :  { %378 = vmatpush.bf16.msra.mxu0 %v1822_v3  ;;  %v2033_v12 = vld [vmem:[#allocation7 + $0xac] sm:$0xf0]  ;;  %v1810_v13 = vor.u32 %v2035_v8, %v1807_v9  ;;  %v2040_v14 = vld [vmem:[#allocation7 + $0xec] sm:$0xf]  ;;  %v1831_v15 = vld [vmem:[#allocation7 + $0xf8] sm:$0xf0] }
  0x1f   :  { %391 = vmatpush.bf16.msra.mxu1 %v1826_v7  ;;  %v1829_v16 = vld [vmem:[#allocation7 + $0xe8] sm:$0xf]  ;;  %v2031_v17 = vld [vmem:[#allocation7 + $0xa4] sm:$0xf]  ;;  %v1791_v18 = vld [vmem:[#allocation7 + $0xb0] sm:$0xf0]  ;;  %v1834_v19 = vor.u32 %v2040_v14, %v1831_v15  ;;  %v1790_v23 = vor.u32 %v2033_v12, %v1789_v11 }
  0x20   :  { %v2042_v20 = vld [vmem:[#allocation7 + $0xf4] sm:$0xf0]  ;;  %v2036_v22 = vld [vmem:[#allocation7 + $0xcc] sm:$0xf]  ;;  %v1815_v24 = vld [vmem:[#allocation7 + $0xd8] sm:$0xf0]  ;;  %v1794_v27 = vor.u32 %v2031_v17, %v1791_v18 }
  0x21   :  { %v1830_v21 = vor.u32 %v2042_v20, %v1829_v16  ;;  %417 = vmatpush.bf16.msra.mxu3 %v1834_v19  ;;  %v1813_v25 = vld [vmem:[#allocation7 + $0xc8] sm:$0xf]  ;;  %v2038_v26 = vld [vmem:[#allocation7 + $0xd4] sm:$0xf0]  ;;  %v1773_v28 = vld [vmem:[#allocation7 + $0x80] sm:$0xf]  ;;  %v1818_v31 = vor.u32 %v2036_v22, %v1815_v24 }
  0x22   :  { %379 = vmatpush.bf16.msra.mxu0 %v1806_v10  ;;  %v2029_v29 = vld [vmem:[#allocation7 + $0x8c] sm:$0xf0]  ;;  %v2027_v30 = vld [vmem:[#allocation7 + $0x84] sm:$0xf]  ;;  %v1814_v32 = vor.u32 %v2038_v26, %v1813_v25  ;;  %v1775_v33 = vld [vmem:[#allocation7 + $0x90] sm:$0xf0] }
  0x23   :  { %392 = vmatpush.bf16.msra.mxu1 %v1810_v13  ;;  %404 = vmatpush.bf16.msra.mxu2 %v1830_v21  ;;  %v2032_v34 = vld [vmem:[#allocation7 + $0xac] sm:$0xf]  ;;  %v1799_v35 = vld [vmem:[#allocation7 + $0xb8] sm:$0xf0]  ;;  %v1797_v36 = vld [vmem:[#allocation7 + $0xa8] sm:$0xf]  ;;  %v1774_v38 = vor.u32 %v2029_v29, %v1773_v28  ;;  %v1778_v42 = vor.u32 %v2027_v30, %v1775_v33 }
  0x24   :  { %v2034_v37 = vld [vmem:[#allocation7 + $0xb4] sm:$0xf0]  ;;  %v1757_v39 = vld [vmem:[#allocation7 + $0x60] sm:$0xf]  ;;  %v2025_v40 = vld [vmem:[#allocation7 + $0x6c] sm:$0xf0]  ;;  %v1802_v41 = vor.u32 %v2032_v34, %v1799_v35 }
  0x25   :  { %418 = vmatpush.bf16.msra.mxu3 %v1818_v31  ;;  %v2023_v43 = vld [vmem:[#allocation7 + $0x64] sm:$0xf]  ;;  %v1798_v44 = vor.u32 %v2034_v37, %v1797_v36  ;;  %v2028_v45 = vld [vmem:[#allocation7 + $0x8c] sm:$0xf]  ;;  %v1783_v46 = vld [vmem:[#allocation7 + $0x98] sm:$0xf0]  ;;  %v1758_v50 = vor.u32 %v2025_v40, %v1757_v39 }
  0x26   :  { %380 = vmatpush.bf16.msra.mxu0 %v1790_v23  ;;  %v1759_v47 = vld [vmem:[#allocation7 + $0x70] sm:$0xf0]  ;;  %v1781_v48 = vld [vmem:[#allocation7 + $0x88] sm:$0xf]  ;;  %v2030_v49 = vld [vmem:[#allocation7 + $0x94] sm:$0xf0]  ;;  %v1786_v53 = vor.u32 %v2028_v45, %v1783_v46 }
  0x27   :  { %393 = vmatpush.bf16.msra.mxu1 %v1794_v27  ;;  %405 = vmatpush.bf16.msra.mxu2 %v1814_v32  ;;  %v1741_v51 = vld [vmem:[#allocation7 + $0x40] sm:$0xf]  ;;  %v2021_v52 = vld [vmem:[#allocation7 + $0x4c] sm:$0xf0]  ;;  %v1762_v54 = vor.u32 %v2023_v43, %v1759_v47  ;;  %v2019_v55 = vld [vmem:[#allocation7 + $0x44] sm:$0xf]  ;;  %v1782_v56 = vor.u32 %v2030_v49, %v1781_v48 }
  0x28   :  { %v2024_v57 = vld [vmem:[#allocation7 + $0x6c] sm:$0xf]  ;;  %v1767_v58 = vld [vmem:[#allocation7 + $0x78] sm:$0xf0]  ;;  %v1743_v59 = vld [vmem:[#allocation7 + $0x50] sm:$0xf0]  ;;  %v1742_v62 = vor.u32 %v2021_v52, %v1741_v51 }
  0x29   :  { %419 = vmatpush.bf16.msra.mxu3 %v1802_v41  ;;  %v1765_v60 = vld [vmem:[#allocation7 + $0x68] sm:$0xf]  ;;  %v2026_v61 = vld [vmem:[#allocation7 + $0x74] sm:$0xf0]  ;;  %v1725_v63 = vld [vmem:[#allocation7 + $0x20] sm:$0xf]  ;;  %v1770_v1 = vor.u32 %v2024_v57, %v1767_v58  ;;  %v1746_v2 = vor.u32 %v2019_v55, %v1743_v59 }
  0x2a   :  { %381 = vmatpush.bf16.msra.mxu0 %v1774_v38  ;;  %v2017_v0 = vld [vmem:[#allocation7 + $0x2c] sm:$0xf0]  ;;  %v2015_v3 = vld [vmem:[#allocation7 + $0x24] sm:$0xf]  ;;  %v1766_v4 = vor.u32 %v2026_v61, %v1765_v60  ;;  %v2020_v5 = vld [vmem:[#allocation7 + $0x4c] sm:$0xf] }
  0x2b   :  { %394 = vmatpush.bf16.msra.mxu1 %v1778_v42  ;;  %406 = vmatpush.bf16.msra.mxu2 %v1798_v44  ;;  %v1751_v6 = vld [vmem:[#allocation7 + $0x58] sm:$0xf0]  ;;  %v1727_v7 = vld [vmem:[#allocation7 + $0x30] sm:$0xf0]  ;;  %v1749_v8 = vld [vmem:[#allocation7 + $0x48] sm:$0xf]  ;;  %v1726_v12 = vor.u32 %v2017_v0, %v1725_v63 }
  0x2c   :  { %v2022_v9 = vld [vmem:[#allocation7 + $0x54] sm:$0xf0]  ;;  %v1709_v10 = vld [vmem:[#allocation7] sm:$0xf]  ;;  %v2013_v11 = vld [vmem:[#allocation7 + $0xc] sm:$0xf0]  ;;  %v1754_v15 = vor.u32 %v2020_v5, %v1751_v6  ;;  %v1730_v18 = vor.u32 %v2015_v3, %v1727_v7 }
  0x2d   :  { %420 = vmatpush.bf16.msra.mxu3 %v1786_v53  ;;  %s2397_s3 = sld [smem:[#allocation2]]  ;;  %v2011_v13 = vld [vmem:[#allocation7 + $0x4] sm:$0xf]  ;;  %v1711_v14 = vld [vmem:[#allocation7 + $0x10] sm:$0xf0]  ;;  %v1750_v20 = vor.u32 %v2022_v9, %v1749_v8  ;;  %vm161_vm0 = vcmask 1040384   ;;  %v1710_v26 = vor.u32 %v2013_v11, %v1709_v10 }
  0x2e   :  { %382 = vmatpush.bf16.msra.mxu0 %v1758_v50  ;;  %v1949_v16 = vld [vmem:[#allocation9 + $0xe0] sm:$0xf]  ;;  %v2073_v17 = vld [vmem:[#allocation9 + $0xec] sm:$0xf0]  ;;  %s2399_s5 = sld [smem:[#allocation2 + $0x1]]  ;;  %v1714_v34 = vor.u32 %v2011_v13, %v1711_v14  ;;  %vm163_vm1 = vcmask 1041408  }
  0x2f   :  { %395 = vmatpush.bf16.msra.mxu1 %v1762_v54  ;;  %407 = vmatpush.bf16.msra.mxu2 %v1782_v56  ;;  %v2071_v19 = vld [vmem:[#allocation9 + $0xe4] sm:$0xf]  ;;  %v2016_v21 = vld [vmem:[#allocation7 + $0x2c] sm:$0xf]  ;;  %v1735_v22 = vld [vmem:[#allocation7 + $0x38] sm:$0xf0]  ;;  %v2409_v35 = vor.u32 %v2073_v17, %v1949_v16 }
  0x30   :  { %s2401_s14 = sld [smem:[#allocation2 + $0x2]]  ;;  %v1951_v23 = vld [vmem:[#allocation9 + $0xf0] sm:$0xf0]  ;;  %v1733_v24 = vld [vmem:[#allocation7 + $0x28] sm:$0xf]  ;;  %v1738_v27 = vor.u32 %v2016_v21, %v1735_v22  ;;  %vm165_vm2 = vcmask 1042432  }
  0x31   :  { %421 = vmatpush.bf16.msra.mxu3 %v1770_v1  ;;  %s2403_s15 = sld [smem:[#allocation2 + $0x3]]  ;;  %v2018_v25 = vld [vmem:[#allocation7 + $0x34] sm:$0xf0]  ;;  %v1933_v28 = vld [vmem:[#allocation9 + $0xc0] sm:$0xf]  ;;  %v2413_v37 = vor.u32 %v2071_v19, %v1951_v23  ;;  %vm167_vm3 = vcmask 1043456  }
  0x32   :  { %383 = vmatpush.bf16.msra.mxu0 %v1742_v62  ;;  %s2405_s16 = sld [smem:[#allocation2 + $0x4]]  ;;  %v2069_v29 = vld [vmem:[#allocation9 + $0xcc] sm:$0xf0]  ;;  %v2067_v30 = vld [vmem:[#allocation9 + $0xc4] sm:$0xf]  ;;  %v1734_v38 = vor.u32 %v2018_v25, %v1733_v24  ;;  %vm169_vm4 = vcmask 1044480  }
  0x33   :  { %396 = vmatpush.bf16.msra.mxu1 %v1746_v2  ;;  %408 = vmatpush.bf16.msra.mxu2 %v1766_v4  ;;  %v1935_v31 = vld [vmem:[#allocation9 + $0xd0] sm:$0xf0]  ;;  %s2407_s17 = sld [smem:[#allocation2 + $0x5]]  ;;  %v2012_v32 = vld [vmem:[#allocation7 + $0xc] sm:$0xf]  ;;  %s109_s19 = scalar_lea.vmem [#allocation6], %s2397_s3  ;;  %v2421_v49 = vor.u32 %v2069_v29, %v1933_v28 }
  0x34   :  { %v1719_v33 = vld [vmem:[#allocation7 + $0x18] sm:$0xf0]  ;;  %s2411_s18 = sld [smem:[#allocation2 + $0x6]]  ;;  %v2072_v36 = vld [vmem:[#allocation9 + $0xec] sm:$0xf]  ;;  %s113_s21 = scalar_lea.vmem [#allocation6], %s2399_s5  ;;  %v2423_v50 = vor.u32 %v2067_v30, %v1935_v31 }
  0x35   :  { %422 = vmatpush.bf16.msra.mxu3 %v1754_v15  ;;  %v110_v39 = vld [vmem:[%s109_s19] sm:$0x1]  ;;  %s2416_s20 = sld [smem:[#allocation2 + $0x7]]  ;;  %v1959_v42 = vld [vmem:[#allocation9 + $0xf8] sm:$0xf0]  ;;  %v1722_v45 = vor.u32 %v2012_v32, %v1719_v33  ;;  %vm171_vm5 = vcmask 1045504  }
  0x36   :  { %384 = vmatpush.bf16.msra.mxu0 %v1726_v12  ;;  %v111_v40 = vmax.f32 %v110_v39, 0.0  ;;  %v114_v41 = vld [vmem:[%s113_s21] sm:$0x1]  ;;  %s117_s22 = scalar_lea.vmem [#allocation6], %s2401_s14  ;;  %v2065_v47 = vld [vmem:[#allocation9 + $0xac] sm:$0xf0]  ;;  %v2426_v55 = vor.u32 %v2072_v36, %v1959_v42 }
  0x37   :  { %397 = vmatpush.bf16.msra.mxu1 %v1730_v18  ;;  %409 = vmatpush.bf16.msra.mxu2 %v1750_v20  ;;  %v115_v43 = vmax.f32 %v114_v41, 0.0  ;;  %v118_v44 = vld [vmem:[%s117_s22] sm:$0x1]  ;;  %v1717_v48 = vld [vmem:[#allocation7 + $0x8] sm:$0xf]  ;;  %s121_s2 = scalar_lea.vmem [#allocation6], %s2403_s15 }
  0x38   :  { %v1917_v46 = vld [vmem:[#allocation9 + $0xa0] sm:$0xf]  ;;  %v119_v51 = vmax.f32 %v118_v44, 0.0  ;;  %v2063_v53 = vld [vmem:[#allocation9 + $0xa4] sm:$0xf]  ;;  %s125_s23 = scalar_lea.vmem [#allocation6], %s2405_s16 }
  0x39   :  { %423 = vmatpush.bf16.msra.mxu3 %v1738_v27  ;;  %v122_v52 = vld [vmem:[%s121_s2] sm:$0x1]  ;;  %v1919_v54 = vld [vmem:[#allocation9 + $0xb0] sm:$0xf0]  ;;  %v2014_v56 = vld [vmem:[#allocation7 + $0x14] sm:$0xf0]  ;;  %v2436_v8 = vor.u32 %v2065_v47, %v1917_v46 }
  0x3a   :  { %385 = vmatpush.bf16.msra.mxu0 %v1710_v26  ;;  %v123_v57 = vmax.f32 %v122_v52, 0.0  ;;  %v126_v58 = vld [vmem:[%s125_s23] sm:$0x1]  ;;  %v141_v59 = vperm.slane %v115_v43, 0  ;;  %v1718_v60 = vor.u32 %v2014_v56, %v1717_v48  ;;  %s129_s24 = scalar_lea.vmem [#allocation6], %s2407_s17  ;;  %v144_v63 = vperm.slane %v119_v51, 0 }
  0x3b   :  { %398 = vmatpush.bf16.msra.mxu1 %v1714_v34  ;;  %410 = vmatpush.bf16.msra.mxu2 %v1734_v38  ;;  %v127_v61 = vmax.f32 %v126_v58, 0.0  ;;  %v130_v62 = vld [vmem:[%s129_s24] sm:$0x1]  ;;  %s133_s25 = scalar_lea.vmem [#allocation6], %s2411_s18  ;;  %s137_s26 = scalar_lea.vmem [#allocation6], %s2416_s20  ;;  %v2441_v13 = vor.u32 %v2063_v53, %v1919_v54  ;;  %vm173_vm6 = vcmask 1046528  }
  0x3c   :  { %v131_v0 = vmax.f32 %v130_v62, 0.0  ;;  %v134_v1 = vld [vmem:[%s133_s25] sm:$0x1]  ;;  %v147_v2 = vperm.slane %v123_v57, 0  ;;  %v162_v3 = vsel %vm161_vm0, %v111_v40, %v141_v59  ;;  %v1957_v9 = vld [vmem:[#allocation9 + $0xe8] sm:$0xf] }
  0x3d   :  { %424 = vmatpush.bf16.msra.mxu3 %v1722_v45  ;;  %v135_v4 = vmax.f32 %v134_v1, 0.0  ;;  %v138_v5 = vld [vmem:[%s137_s26] sm:$0x1]  ;;  %v150_v6 = vperm.slane %v127_v61, 0  ;;  %v164_v7 = vsel %vm163_vm1, %v162_v3, %v144_v63  ;;  %v2074_v14 = vld [vmem:[#allocation9 + $0xf4] sm:$0xf0] }
  0x3e   :  { %624 = vmatpush.bf16.msrb.mxu0 %v2409_v35  ;;  %v139_v10 = vmax.f32 %v138_v5, 0.0  ;;  %v153_v11 = vperm.slane %v131_v0, 0  ;;  %v166_v12 = vsel %vm165_vm2, %v164_v7, %v147_v2  ;;  %v1901_v15 = vld [vmem:[#allocation9 + $0x80] sm:$0xf]  ;;  %v2444_v18 = vor.u32 %v2074_v14, %v1957_v9  ;;  %v2061_v19 = vld [vmem:[#allocation9 + $0x8c] sm:$0xf0] }
  0x3f   :  { %637 = vmatpush.bf16.msrb.mxu1 %v2413_v37  ;;  %411 = vmatpush.bf16.msra.mxu2 %v1718_v60  ;;  %v156_v16 = vperm.slane %v135_v4, 0  ;;  %v168_v17 = vsel %vm167_vm3, %v166_v12, %v150_v6  ;;  %v2059_v20 = vld [vmem:[#allocation9 + $0x84] sm:$0xf]  ;;  %v1903_v23 = vld [vmem:[#allocation9 + $0x90] sm:$0xf0]  ;;  %v2450_v26 = vor.u32 %v2061_v19, %v1901_v15  ;;  %s1675_s13 = sshll.u32 %s2880_s8, 4  ;;  %s1676_s13 = int_to_ptr.hbm [resolvable:$true] %s1675_s13 }
  0x40   :  { %v159_v21 = vperm.slane %v139_v10, 0  ;;  %v170_v22 = vsel %vm169_vm4, %v168_v17, %v153_v11  ;;  %v2068_v24 = vld [vmem:[#allocation9 + $0xcc] sm:$0xf]  ;;  %v1943_v27 = vld [vmem:[#allocation9 + $0xd8] sm:$0xf0]  ;;  %v2454_v31 = vor.u32 %v2059_v20, %v1903_v23 }
  0x41   :  { %663 = vmatpush.bf16.msrb.mxu3 %v2426_v55  ;;  %v172_v25 = vsel %vm171_vm5, %v170_v22, %v156_v16  ;;  %v1941_v28 = vld [vmem:[#allocation9 + $0xc8] sm:$0xf]  ;;  %v2070_v29 = vld [vmem:[#allocation9 + $0xd4] sm:$0xf0]  ;;  %v2456_v32 = vor.u32 %v2068_v24, %v1943_v27  ;;  %v1885_v34 = vld [vmem:[#allocation9 + $0x60] sm:$0xf] }
  0x42   :  { %625 = vmatpush.bf16.msrb.mxu0 %v2421_v49  ;;  %v174_v30 = vsel %vm173_vm6, %v172_v25, %v159_v21  ;;  %v2458_v33 = vor.u32 %v2070_v29, %v1941_v28  ;;  %v2057_v36 = vld [vmem:[#allocation9 + $0x6c] sm:$0xf0]  ;;  %v2055_v38 = vld [vmem:[#allocation9 + $0x64] sm:$0xf]  ;;  %v1887_v40 = vld [vmem:[#allocation9 + $0x70] sm:$0xf0] }
  0x43   :  { %638 = vmatpush.bf16.msrb.mxu1 %v2423_v50  ;;  %650 = vmatpush.bf16.msrb.mxu2 %v2444_v18  ;;  %v175_v39 = vpack.c.bf16 %v174_v30, %v174_v30  ;;  %v2064_v41 = vld [vmem:[#allocation9 + $0xac] sm:$0xf]  ;;  %v1927_v42 = vld [vmem:[#allocation9 + $0xb8] sm:$0xf0]  ;;  %v1925_v44 = vld [vmem:[#allocation9 + $0xa8] sm:$0xf]  ;;  %v2468_v51 = vor.u32 %v2057_v36, %v1885_v34  ;;  %v2470_v52 = vor.u32 %v2055_v38, %v1887_v40 }
  0x44   :  { %v2461_v43 = vor.u32 %v2064_v41, %v1927_v42  ;;  %v2066_v45 = vld [vmem:[#allocation9 + $0xb4] sm:$0xf0]  ;;  %v1869_v47 = vld [vmem:[#allocation9 + $0x40] sm:$0xf]  ;;  %v2053_v48 = vld [vmem:[#allocation9 + $0x4c] sm:$0xf0] }
  0x45   :  { %664 = vmatpush.bf16.msrb.mxu3 %v2456_v32  ;;  %386 = vmatmul.bf16.vlgmr.msra.gmra.mxu0 %v175_v39  ;;  %v2464_v46 = vor.u32 %v2066_v45, %v1925_v44  ;;  %v2060_v53 = vld [vmem:[#allocation9 + $0x8c] sm:$0xf]  ;;  %v1911_v54 = vld [vmem:[#allocation9 + $0x98] sm:$0xf0]  ;;  %v1909_v56 = vld [vmem:[#allocation9 + $0x88] sm:$0xf]  ;;  %v2480_v0 = vor.u32 %v2053_v48, %v1869_v47 }
  0x46   :  { %626 = vmatpush.bf16.msrb.mxu0 %v2436_v8  ;;  %399 = vmatmul.bf16.vlgmr.msra.gmra.mxu1 %v175_v39  ;;  %v2051_v57 = vld [vmem:[#allocation9 + $0x44] sm:$0xf]  ;;  %v1871_v58 = vld [vmem:[#allocation9 + $0x50] sm:$0xf0]  ;;  %v2062_v59 = vld [vmem:[#allocation9 + $0x94] sm:$0xf0]  ;;  %v2473_v60 = vor.u32 %v2060_v53, %v1911_v54 }
  0x47   :  { %639 = vmatpush.bf16.msrb.mxu1 %v2441_v13  ;;  %651 = vmatpush.bf16.msrb.mxu2 %v2458_v33  ;;  %v2476_v61 = vor.u32 %v2062_v59, %v1909_v56  ;;  %v2056_v62 = vld [vmem:[#allocation9 + $0x6c] sm:$0xf]  ;;  %v1895_v63 = vld [vmem:[#allocation9 + $0x78] sm:$0xf0]  ;;  %v2482_v1 = vor.u32 %v2051_v57, %v1871_v58  ;;  %v1853_v2 = vld [vmem:[#allocation9 + $0x20] sm:$0xf] }
  0x48   :  { %425 = vmatmul.bf16.vlgmr.msra.gmra.mxu3 %v175_v39  ;;  %412 = vmatmul.bf16.vlgmr.msra.gmra.mxu2 %v175_v39  ;;  %v1893_v3 = vld [vmem:[#allocation9 + $0x68] sm:$0xf]  ;;  %v2058_v4 = vld [vmem:[#allocation9 + $0x74] sm:$0xf0]  ;;  %v2049_v5 = vld [vmem:[#allocation9 + $0x2c] sm:$0xf0]  ;;  %v2485_v9 = vor.u32 %v2056_v62, %v1895_v63 }
  0x49   :  { %665 = vmatpush.bf16.msrb.mxu3 %v2461_v43  ;;  %v2047_v6 = vld [vmem:[#allocation9 + $0x24] sm:$0xf]  ;;  %v1855_v7 = vld [vmem:[#allocation9 + $0x30] sm:$0xf0]  ;;  %v2488_v10 = vor.u32 %v2058_v4, %v1893_v3  ;;  %v2052_v11 = vld [vmem:[#allocation9 + $0x4c] sm:$0xf]  ;;  %v2492_v14 = vor.u32 %v2049_v5, %v1853_v2 }
  0x4a   :  { %627 = vmatpush.bf16.msrb.mxu0 %v2450_v26  ;;  %v1879_v12 = vld [vmem:[#allocation9 + $0x58] sm:$0xf0]  ;;  %v2494_v15 = vor.u32 %v2047_v6, %v1855_v7  ;;  %v1837_v16 = vld [vmem:[#allocation9] sm:$0xf]  ;;  %v1877_v17 = vld [vmem:[#allocation9 + $0x48] sm:$0xf] }
  0x4b   :  { %640 = vmatpush.bf16.msrb.mxu1 %v2454_v31  ;;  %652 = vmatpush.bf16.msrb.mxu2 %v2464_v46  ;;  %v2054_v19 = vld [vmem:[#allocation9 + $0x54] sm:$0xf0]  ;;  %v2045_v20 = vld [vmem:[#allocation9 + $0xc] sm:$0xf0]  ;;  %v2043_v21 = vld [vmem:[#allocation9 + $0x4] sm:$0xf]  ;;  %v2497_v23 = vor.u32 %v2052_v11, %v1879_v12 }
  0x4c   :  { %v1839_v22 = vld [vmem:[#allocation9 + $0x10] sm:$0xf0]  ;;  %v2500_v24 = vor.u32 %v2054_v19, %v1877_v17  ;;  %v2048_v25 = vld [vmem:[#allocation9 + $0x2c] sm:$0xf]  ;;  %v1863_v27 = vld [vmem:[#allocation9 + $0x38] sm:$0xf0]  ;;  %v2504_v28 = vor.u32 %v2045_v20, %v1837_v16 }
  0x4d   :  { %666 = vmatpush.bf16.msrb.mxu3 %v2473_v60  ;;  %v2506_v29 = vor.u32 %v2043_v21, %v1839_v22  ;;  %v2511_v30 = vld [vmem:[%s2879_s7] sm:$0x1]  ;;  %v1861_v34 = vld [vmem:[#allocation9 + $0x28] sm:$0xf]  ;;  %v2050_v36 = vld [vmem:[#allocation9 + $0x34] sm:$0xf0]  ;;  %v2514_v38 = vor.u32 %v2048_v25, %v1863_v27 }
  0x4e   :  { %628 = vmatpush.bf16.msrb.mxu0 %v2468_v51  ;;  %v463_v39 = vpack.c.bf16 %v2511_v30, %v2511_v30  ;;  %v2044_v40 = vld [vmem:[#allocation9 + $0xc] sm:$0xf]  ;;  %v1847_v41 = vld [vmem:[#allocation9 + $0x18] sm:$0xf0]  ;;  %v2521_v42 = vor.u32 %v2050_v36, %v1861_v34  ;;  %v1845_v44 = vld [vmem:[#allocation9 + $0x8] sm:$0xf] }
  0x4f   :  { %641 = vmatpush.bf16.msrb.mxu1 %v2470_v52  ;;  %653 = vmatpush.bf16.msrb.mxu2 %v2476_v61  ;;  %v2046_v45 = vld [vmem:[#allocation9 + $0x14] sm:$0xf0]  ;;  %v2526_v47 = vor.u32 %v2044_v40, %v1847_v41  ;;  %v208_v62 = vld [vmem:[%s2876_s4] sm:$0xf] }
  0x50   :  { %v2529_v48 = vor.u32 %v2046_v45, %v1845_v44  ;;  %v210_v63 = vperm.slane %v208_v62, 0  ;;  %v211_v2 = vperm.slane %v208_v62, 1  ;;  %v213_v45 = vperm.slane %v208_v62, 3 }
  0x51   :  { %667 = vmatpush.bf16.msrb.mxu3 %v2485_v9 }
  0x52   :  { %629 = vmatpush.bf16.msrb.mxu0 %v2480_v0 }
  0x53   :  { %642 = vmatpush.bf16.msrb.mxu1 %v2482_v1  ;;  %654 = vmatpush.bf16.msrb.mxu2 %v2488_v10 }
  0x55   :  { %668 = vmatpush.bf16.msrb.mxu3 %v2497_v23 }
  0x56   :  { %630 = vmatpush.bf16.msrb.mxu0 %v2492_v14 }
  0x57   :  { %643 = vmatpush.bf16.msrb.mxu1 %v2494_v15  ;;  %655 = vmatpush.bf16.msrb.mxu2 %v2500_v24 }
  0x59   :  { %669 = vmatpush.bf16.msrb.mxu3 %v2514_v38 }
  0x5a   :  { %631 = vmatpush.bf16.msrb.mxu0 %v2504_v28 }
  0x5b   :  { %644 = vmatpush.bf16.msrb.mxu1 %v2506_v29  ;;  %656 = vmatpush.bf16.msrb.mxu2 %v2521_v42 }
  0x5d   :  { %632 = vmatmul.bf16.vlgmr.msrb.gmra.mxu0 %v463_v39  ;;  %670 = vmatpush.bf16.msrb.mxu3 %v2526_v47 }
  0x5e   :  { %726 = vmatpush.bf16.msra.mxu0 %v2409_v35  ;;  %645 = vmatmul.bf16.vlgmr.msrb.gmra.mxu1 %v463_v39 }
  0x5f   :  { %739 = vmatpush.bf16.msra.mxu1 %v2413_v37  ;;  %657 = vmatpush.bf16.msrb.mxu2 %v2529_v48 }
  0x60   :  { %671 = vmatmul.bf16.vlgmr.msrb.gmra.mxu3 %v463_v39 }
  0x61   :  { %765 = vmatpush.bf16.msra.mxu3 %v2426_v55 }
  0x62   :  { %727 = vmatpush.bf16.msra.mxu0 %v2421_v49  ;;  %658 = vmatmul.bf16.vlgmr.msrb.gmra.mxu2 %v463_v39 }
  0x63   :  { %740 = vmatpush.bf16.msra.mxu1 %v2423_v50  ;;  %752 = vmatpush.bf16.msra.mxu2 %v2444_v18 }
  0x65   :  { %766 = vmatpush.bf16.msra.mxu3 %v2456_v32 }
  0x66   :  { %728 = vmatpush.bf16.msra.mxu0 %v2436_v8 }
  0x67   :  { %741 = vmatpush.bf16.msra.mxu1 %v2441_v13  ;;  %753 = vmatpush.bf16.msra.mxu2 %v2458_v33 }
  0x69   :  { %767 = vmatpush.bf16.msra.mxu3 %v2461_v43 }
  0x6a   :  { %729 = vmatpush.bf16.msra.mxu0 %v2450_v26 }
  0x6b   :  { %742 = vmatpush.bf16.msra.mxu1 %v2454_v31  ;;  %754 = vmatpush.bf16.msra.mxu2 %v2464_v46 }
  0x6d   :  { %768 = vmatpush.bf16.msra.mxu3 %v2473_v60 }
  0x6e   :  { %730 = vmatpush.bf16.msra.mxu0 %v2468_v51 }
  0x6f   :  { %743 = vmatpush.bf16.msra.mxu1 %v2470_v52  ;;  %755 = vmatpush.bf16.msra.mxu2 %v2476_v61 }
  0x71   :  { %769 = vmatpush.bf16.msra.mxu3 %v2485_v9 }
  0x72   :  { %731 = vmatpush.bf16.msra.mxu0 %v2480_v0 }
  0x73   :  { %744 = vmatpush.bf16.msra.mxu1 %v2482_v1  ;;  %756 = vmatpush.bf16.msra.mxu2 %v2488_v10 }
  0x75   :  { %770 = vmatpush.bf16.msra.mxu3 %v2497_v23 }
  0x76   :  { %732 = vmatpush.bf16.msra.mxu0 %v2492_v14 }
  0x77   :  { %745 = vmatpush.bf16.msra.mxu1 %v2494_v15  ;;  %757 = vmatpush.bf16.msra.mxu2 %v2500_v24 }
  0x79   :  { %771 = vmatpush.bf16.msra.mxu3 %v2514_v38 }
  0x7a   :  { %733 = vmatpush.bf16.msra.mxu0 %v2504_v28 }
  0x7b   :  { %746 = vmatpush.bf16.msra.mxu1 %v2506_v29  ;;  %758 = vmatpush.bf16.msra.mxu2 %v2521_v42 }
  0x7d   :  { %772 = vmatpush.bf16.msra.mxu3 %v2526_v47 }
  0x7e   :  { %847 = vmatpush.bf16.msrb.mxu0 %v2409_v35 }
  0x7f   :  { %860 = vmatpush.bf16.msrb.mxu1 %v2413_v37  ;;  %759 = vmatpush.bf16.msra.mxu2 %v2529_v48 }
  0x81   :  { %886 = vmatpush.bf16.msrb.mxu3 %v2426_v55 }
  0x82   :  { %848 = vmatpush.bf16.msrb.mxu0 %v2421_v49 }
  0x83   :  { %861 = vmatpush.bf16.msrb.mxu1 %v2423_v50  ;;  %873 = vmatpush.bf16.msrb.mxu2 %v2444_v18 }
  0x85   :  { %887 = vmatpush.bf16.msrb.mxu3 %v2456_v32 }
  0x86   :  { %849 = vmatpush.bf16.msrb.mxu0 %v2436_v8 }
  0x87   :  { %862 = vmatpush.bf16.msrb.mxu1 %v2441_v13  ;;  %874 = vmatpush.bf16.msrb.mxu2 %v2458_v33 }
  0x89   :  { %888 = vmatpush.bf16.msrb.mxu3 %v2461_v43 }
  0x8a   :  { %850 = vmatpush.bf16.msrb.mxu0 %v2450_v26 }
  0x8b   :  { %863 = vmatpush.bf16.msrb.mxu1 %v2454_v31  ;;  %875 = vmatpush.bf16.msrb.mxu2 %v2464_v46 }
  0x8d   :  { %889 = vmatpush.bf16.msrb.mxu3 %v2473_v60 }
  0x8e   :  { %851 = vmatpush.bf16.msrb.mxu0 %v2468_v51 }
  0x8f   :  { %864 = vmatpush.bf16.msrb.mxu1 %v2470_v52  ;;  %876 = vmatpush.bf16.msrb.mxu2 %v2476_v61 }
  0x91   :  { %890 = vmatpush.bf16.msrb.mxu3 %v2485_v9 }
  0x92   :  { %852 = vmatpush.bf16.msrb.mxu0 %v2480_v0 }
  0x93   :  { %865 = vmatpush.bf16.msrb.mxu1 %v2482_v1  ;;  %877 = vmatpush.bf16.msrb.mxu2 %v2488_v10 }
  0x95   :  { %891 = vmatpush.bf16.msrb.mxu3 %v2497_v23 }
  0x96   :  { %853 = vmatpush.bf16.msrb.mxu0 %v2492_v14 }
  0x97   :  { %866 = vmatpush.bf16.msrb.mxu1 %v2494_v15  ;;  %878 = vmatpush.bf16.msrb.mxu2 %v2500_v24 }
  0x99   :  { %892 = vmatpush.bf16.msrb.mxu3 %v2514_v38 }
  0x9a   :  { %854 = vmatpush.bf16.msrb.mxu0 %v2504_v28 }
  0x9b   :  { %867 = vmatpush.bf16.msrb.mxu1 %v2506_v29  ;;  %879 = vmatpush.bf16.msrb.mxu2 %v2521_v42 }
  0x9d   :  { %893 = vmatpush.bf16.msrb.mxu3 %v2526_v47 }
  0x9f   :  { %880 = vmatpush.bf16.msrb.mxu2 %v2529_v48 }
  0xc2   :  { %v387_v53 = vpop.f32.mrf.mxu0 }
  0xc3   :  { %v400_v54 = vpop.f32.mrf.mxu1  ;;  %v2598_v5 = vadd.f32 %v387_v53, %v210_v63 }
  0xc4   :  { %v2600_v6 = vadd.f32 %v400_v54, %v211_v2 }
  0xca   :  { %v389_v56 = vpop.f32.mrf.mxu0 }
  0xcb   :  { %v426_v57 = vpop.f32.mrf.mxu3  ;;  %v413_v58 = vpop.f32.mrf.mxu2 }
  0xcc   :  { %v402_v59 = vpop.f32.mrf.mxu1 }
  0xcd   :  { %v212_v59 = vperm.slane %v208_v62, 2 }
  0xd3   :  { %v428_v3 = vpop.f32.mrf.mxu3  ;;  %v415_v4 = vpop.f32.mrf.mxu2 }
  0xd4   :  { %v2604_v4 = vadd.f32 %v426_v57, %v213_v45 }
  0xda   :  { %v633_v7 = vpop.f32.mrf.mxu0 }
  0xdb   :  { %v646_v11 = vpop.f32.mrf.mxu1  ;;  %v676_v12 = vadd.f32 %v633_v7, %v2598_v5 }
  0xdc   :  { %v677_v16 = vadd.f32 %v646_v11, %v2600_v6 }
  0xdd   :  { %v1963_v17 = vmul.f32 -1.442695, %v676_v12 }
  0xde   :  { %v1964_v19 = vmul.f32 -1.442695, %v677_v16  ;;  %v2606_v16 = vadd.f32 %v413_v58, %v212_v59 }
  0xdf   :  { %2095 = vpow2.f32 %v1963_v17 }
  0xe0   :  { %2097 = vpow2.f32 %v1964_v19 }
  0xe2   :  { %v635_v20 = vpop.f32.mrf.mxu0 }
  0xe3   :  { %v648_v21 = vpop.f32.mrf.mxu1  ;;  %v672_v34 = vpop.f32.mrf.mxu3 }
  0xe4   :  { %v679_v20 = vadd.f32 %v672_v34, %v2604_v4 }
  0xe5   :  { %v2096_v22 = vpop.eup %2095  ;;  %v659_v39 = vpop.f32.mrf.mxu2 }
  0xe6   :  { %v2098_v25 = vpop.eup %2097  ;;  %v683_v27 = vadd.f32 1.0, %v2096_v22 }
  0xe7   :  { %v702_v36 = vadd.f32 1.0, %v2098_v25 }
  0xe8   :  { %2099 = vrcp.f32 %v683_v27  ;;  %v695_v3 = vand.u32 2147483648, %v683_v27  ;;  %v693_v11 = vand.u32 2147483647, %v683_v27  ;;  %vm689_vm8 = vweird.f32 %v683_v27 }
  0xe9   :  { %2101 = vrcp.f32 %v702_v36  ;;  %v714_v25 = vand.u32 2147483648, %v702_v36  ;;  %vm708_vm12 = vweird.f32 %v702_v36  ;;  %v712_v45 = vand.u32 2147483647, %v702_v36 }
  0xea   :  { %v696_v19 = vor.u32 1.1754944e-38, %v695_v3  ;;  %vm694_vm10 = vcmp.eq.f32.partialorder %v693_v11, 8.507059e+37 }
  0xeb   :  { %v674_v41 = vpop.f32.mrf.mxu3  ;;  %vm713_vm14 = vcmp.eq.f32.partialorder %v712_v45, 8.507059e+37 }
  0xec   :  { %v678_v41 = vadd.f32 %v659_v39, %v2606_v16 }
  0xed   :  { %v661_v56 = vpop.f32.mrf.mxu2 }
  0xee   :  { %v2100_v40 = vpop.eup %2099 }
  0xef   :  { %v2102_v44 = vpop.eup %2101  ;;  %v685_v53 = vmul.f32 %v2100_v40, %v683_v27  ;;  %vm690_vm7 = vweird.f32 %v2100_v40 }
  0xf0   :  { %v704_v54 = vmul.f32 %v2102_v44, %v702_v36  ;;  %vm691_vm9 = vmor %vm689_vm8, %vm690_vm7  ;;  %vm709_vm11 = vweird.f32 %v2102_v44 }
  0xf1   :  { %v686_v63 = vsub.f32 1.0, %v685_v53  ;;  %vm710_vm13 = vmor %vm708_vm12, %vm709_vm11 }
  0xf2   :  { %v705_v2 = vsub.f32 1.0, %v704_v54  ;;  %v715_v54 = vor.u32 1.1754944e-38, %v714_v25 }
  0xf3   :  { %v687_v7 = vmul.f32 %v2100_v40, %v686_v63 }
  0xf4   :  { %v706_v12 = vmul.f32 %v2102_v44, %v705_v2 }
  0xf5   :  { %v688_v17 = vadd.f32 %v2100_v40, %v687_v7 }
  0xf6   :  { %v707_v22 = vadd.f32 %v2102_v44, %v706_v12 }
  0xf7   :  { %v692_v21 = vsel %vm691_vm9, %v2100_v40, %v688_v17 }
  0xf8   :  { %v697_v62 = vsel %vm694_vm10, %v696_v19, %v692_v21  ;;  %v711_v53 = vsel %vm710_vm13, %v2102_v44, %v707_v22 }
  0xf9   :  { %v718_v57 = vmul.f32 %v697_v62, %v679_v20  ;;  %v716_v27 = vsel %vm713_vm14, %v715_v54, %v711_v53 }
  0xfa   :  { %v721_v56 = vsub.f32 1.0, %v716_v27  ;;  %v723_v59 = vmul.f32 %v716_v27, %v2511_v30 }
  0xfb   :  { %v719_v58 = vadd.f32 %v718_v57, %v678_v41 }
  0xfd   :  { %2103 = vtanh.f32 %v719_v58 }
 0x103   :  { %v2104_v34 = vpop.eup %2103 }
 0x104   :  { %v722_v40 = vmul.f32 %v2104_v34, %v721_v56 }
 0x106   :  { %v2611_v63 = vadd.f32 %v723_v59, %v722_v40 }
 0x108   :  { %v725_v2 = vpack.c.bf16 %v2611_v63, %v2611_v63 }
 0x10a   :  { %734 = vmatmul.bf16.vlgmr.msra.gmra.mxu0 %v725_v2  ;;  %747 = vmatmul.bf16.vlgmr.msra.gmra.mxu1 %v725_v2 }
 0x10b   :  { %760 = vmatmul.bf16.vlgmr.msra.gmra.mxu2 %v725_v2  ;;  %773 = vmatmul.bf16.vlgmr.msra.gmra.mxu3 %v725_v2 }
 0x10c   :  { %967 = vmatpush.bf16.msra.mxu0 %v2409_v35  ;;  %980 = vmatpush.bf16.msra.mxu1 %v2413_v37 }
 0x10d   :  { %993 = vmatpush.bf16.msra.mxu2 %v2444_v18  ;;  %1006 = vmatpush.bf16.msra.mxu3 %v2426_v55 }
 0x110   :  { %968 = vmatpush.bf16.msra.mxu0 %v2421_v49  ;;  %981 = vmatpush.bf16.msra.mxu1 %v2423_v50 }
 0x111   :  { %994 = vmatpush.bf16.msra.mxu2 %v2458_v33  ;;  %1007 = vmatpush.bf16.msra.mxu3 %v2456_v32 }
 0x114   :  { %969 = vmatpush.bf16.msra.mxu0 %v2436_v8  ;;  %982 = vmatpush.bf16.msra.mxu1 %v2441_v13 }
 0x115   :  { %995 = vmatpush.bf16.msra.mxu2 %v2464_v46  ;;  %1008 = vmatpush.bf16.msra.mxu3 %v2461_v43 }
 0x118   :  { %970 = vmatpush.bf16.msra.mxu0 %v2450_v26  ;;  %983 = vmatpush.bf16.msra.mxu1 %v2454_v31 }
 0x119   :  { %996 = vmatpush.bf16.msra.mxu2 %v2476_v61  ;;  %1009 = vmatpush.bf16.msra.mxu3 %v2473_v60 }
 0x11c   :  { %971 = vmatpush.bf16.msra.mxu0 %v2468_v51  ;;  %984 = vmatpush.bf16.msra.mxu1 %v2470_v52 }
 0x11d   :  { %997 = vmatpush.bf16.msra.mxu2 %v2488_v10  ;;  %1010 = vmatpush.bf16.msra.mxu3 %v2485_v9 }
 0x120   :  { %972 = vmatpush.bf16.msra.mxu0 %v2480_v0  ;;  %985 = vmatpush.bf16.msra.mxu1 %v2482_v1 }
 0x121   :  { %998 = vmatpush.bf16.msra.mxu2 %v2500_v24  ;;  %1011 = vmatpush.bf16.msra.mxu3 %v2497_v23 }
 0x124   :  { %973 = vmatpush.bf16.msra.mxu0 %v2492_v14  ;;  %986 = vmatpush.bf16.msra.mxu1 %v2494_v15 }
 0x125   :  { %999 = vmatpush.bf16.msra.mxu2 %v2521_v42  ;;  %1012 = vmatpush.bf16.msra.mxu3 %v2514_v38 }
 0x128   :  { %974 = vmatpush.bf16.msra.mxu0 %v2504_v28  ;;  %987 = vmatpush.bf16.msra.mxu1 %v2506_v29 }
 0x129   :  { %1000 = vmatpush.bf16.msra.mxu2 %v2529_v48  ;;  %1013 = vmatpush.bf16.msra.mxu3 %v2526_v47 }
 0x187   :  { %v735_v30 = vpop.f32.mrf.mxu0  ;;  %v748_v36 = vpop.f32.mrf.mxu1 }
 0x188   :  { %v782_v39 = vrot.slane %v735_v30, 7  ;;  %v783_v44 = vrot.slane %v748_v36, 7 }
 0x18a   :  { %v790_v3 = vadd.f32 %v782_v39, %v2598_v5  ;;  %v791_v7 = vadd.f32 %v783_v44, %v2600_v6 }
 0x18c   :  { %v1965_v11 = vmul.f32 -1.442695, %v790_v3  ;;  %v1966_v12 = vmul.f32 -1.442695, %v791_v7 }
 0x18e   :  { %2105 = vpow2.f32 %v1965_v11  ;;  %v761_v17 = vpop.f32.mrf.mxu2  ;;  %v774_v19 = vpop.f32.mrf.mxu3 }
 0x18f   :  { %2107 = vpow2.f32 %v1966_v12  ;;  %v737_v20 = vpop.f32.mrf.mxu0  ;;  %v750_v21 = vpop.f32.mrf.mxu1  ;;  %v785_v59 = vrot.slane %v774_v19, 7  ;;  %v784_v39 = vrot.slane %v761_v17, 7 }
 0x191   :  { %v793_v7 = vadd.f32 %v785_v59, %v2604_v4 }
 0x194   :  { %v2106_v62 = vpop.eup %2105 }
 0x195   :  { %v2108_v22 = vpop.eup %2107  ;;  %v797_v25 = vadd.f32 1.0, %v2106_v62  ;;  %v792_v62 = vadd.f32 %v784_v39, %v2606_v16 }
 0x196   :  { %v816_v57 = vadd.f32 1.0, %v2108_v22  ;;  %v763_v41 = vpop.f32.mrf.mxu2  ;;  %v776_v45 = vpop.f32.mrf.mxu3 }
 0x197   :  { %2109 = vrcp.f32 %v797_v25  ;;  %v809_v40 = vand.u32 2147483648, %v797_v25  ;;  %v807_v30 = vand.u32 2147483647, %v797_v25  ;;  %vm803_vm7 = vweird.f32 %v797_v25 }
 0x198   :  { %2111 = vrcp.f32 %v816_v57  ;;  %v828_v21 = vand.u32 2147483648, %v816_v57  ;;  %vm822_vm11 = vweird.f32 %v816_v57  ;;  %v826_v22 = vand.u32 2147483647, %v816_v57 }
 0x199   :  { %v810_v3 = vor.u32 1.1754944e-38, %v809_v40  ;;  %vm808_vm9 = vcmp.eq.f32.partialorder %v807_v30, 8.507059e+37 }
 0x19a   :  { %v829_v45 = vor.u32 1.1754944e-38, %v828_v21  ;;  %vm827_vm13 = vcmp.eq.f32.partialorder %v826_v22, 8.507059e+37 }
 0x19d   :  { %v2110_v58 = vpop.eup %2109 }
 0x19e   :  { %v2112_v53 = vpop.eup %2111  ;;  %v799_v54 = vmul.f32 %v2110_v58, %v797_v25  ;;  %vm804_vm15 = vweird.f32 %v2110_v58 }
 0x19f   :  { %v818_v27 = vmul.f32 %v2112_v53, %v816_v57  ;;  %vm805_vm8 = vmor %vm803_vm7, %vm804_vm15  ;;  %vm823_vm10 = vweird.f32 %v2112_v53 }
 0x1a0   :  { %v800_v56 = vsub.f32 1.0, %v799_v54  ;;  %vm824_vm12 = vmor %vm822_vm11, %vm823_vm10 }
 0x1a1   :  { %v819_v34 = vsub.f32 1.0, %v818_v27 }
 0x1a2   :  { %v801_v2 = vmul.f32 %v2110_v58, %v800_v56 }
 0x1a3   :  { %v820_v36 = vmul.f32 %v2112_v53, %v819_v34 }
 0x1a4   :  { %v802_v44 = vadd.f32 %v2110_v58, %v801_v2 }
 0x1a5   :  { %v821_v12 = vadd.f32 %v2112_v53, %v820_v36 }
 0x1a6   :  { %v806_v11 = vsel %vm805_vm8, %v2110_v58, %v802_v44  ;;  %v838_v58 = vrot.slane %v2611_v63, 7 }
 0x1a7   :  { %v811_v20 = vsel %vm808_vm9, %v810_v3, %v806_v11  ;;  %v825_v17 = vsel %vm824_vm12, %v2112_v53, %v821_v12 }
 0x1a8   :  { %v832_v19 = vmul.f32 %v811_v20, %v793_v7  ;;  %v830_v25 = vsel %vm827_vm13, %v829_v45, %v825_v17 }
 0x1a9   :  { %v835_v54 = vsub.f32 1.0, %v830_v25  ;;  %v840_v34 = vmul.f32 %v838_v58, %v830_v25 }
 0x1aa   :  { %v833_v41 = vadd.f32 %v832_v19, %v792_v62 }
 0x1ac   :  { %2113 = vtanh.f32 %v833_v41 }
 0x1b2   :  { %v2114_v27 = vpop.eup %2113 }
 0x1b3   :  { %v836_v56 = vmul.f32 %v2114_v27, %v835_v54 }
 0x1b5   :  { %v2652_v40 = vadd.f32 %v840_v34, %v836_v56 }
 0x1b7   :  { %v842_v59 = vpack.c.bf16 %v2652_v40, %v2652_v40 }
 0x1b9   :  { %v844_v2 = vshrl.u32 %v842_v59, 16 }
 0x1bb   :  { %855 = vmatmul.bf16.vlgmr.msrb.gmra.mxu0 %v844_v2  ;;  %868 = vmatmul.bf16.vlgmr.msrb.gmra.mxu1 %v844_v2 }
 0x1bc   :  { %881 = vmatmul.bf16.vlgmr.msrb.gmra.mxu2 %v844_v2  ;;  %894 = vmatmul.bf16.vlgmr.msrb.gmra.mxu3 %v844_v2 }
 0x1bd   :  { %1089 = vmatpush.bf16.msrb.mxu0 %v2409_v35  ;;  %1102 = vmatpush.bf16.msrb.mxu1 %v2413_v37 }
 0x1be   :  { %1115 = vmatpush.bf16.msrb.mxu2 %v2444_v18  ;;  %1128 = vmatpush.bf16.msrb.mxu3 %v2426_v55 }
 0x1c1   :  { %1090 = vmatpush.bf16.msrb.mxu0 %v2421_v49  ;;  %1103 = vmatpush.bf16.msrb.mxu1 %v2423_v50 }
 0x1c2   :  { %1116 = vmatpush.bf16.msrb.mxu2 %v2458_v33  ;;  %1129 = vmatpush.bf16.msrb.mxu3 %v2456_v32 }
 0x1c5   :  { %1091 = vmatpush.bf16.msrb.mxu0 %v2436_v8  ;;  %1104 = vmatpush.bf16.msrb.mxu1 %v2441_v13 }
 0x1c6   :  { %1117 = vmatpush.bf16.msrb.mxu2 %v2464_v46  ;;  %1130 = vmatpush.bf16.msrb.mxu3 %v2461_v43 }
 0x1c9   :  { %1092 = vmatpush.bf16.msrb.mxu0 %v2450_v26  ;;  %1105 = vmatpush.bf16.msrb.mxu1 %v2454_v31 }
 0x1ca   :  { %1118 = vmatpush.bf16.msrb.mxu2 %v2476_v61  ;;  %1131 = vmatpush.bf16.msrb.mxu3 %v2473_v60 }
 0x1cd   :  { %1093 = vmatpush.bf16.msrb.mxu0 %v2468_v51  ;;  %1106 = vmatpush.bf16.msrb.mxu1 %v2470_v52 }
 0x1ce   :  { %1119 = vmatpush.bf16.msrb.mxu2 %v2488_v10  ;;  %1132 = vmatpush.bf16.msrb.mxu3 %v2485_v9 }
 0x1d1   :  { %1094 = vmatpush.bf16.msrb.mxu0 %v2480_v0  ;;  %1107 = vmatpush.bf16.msrb.mxu1 %v2482_v1 }
 0x1d2   :  { %1120 = vmatpush.bf16.msrb.mxu2 %v2500_v24  ;;  %1133 = vmatpush.bf16.msrb.mxu3 %v2497_v23 }
 0x1d5   :  { %1095 = vmatpush.bf16.msrb.mxu0 %v2492_v14  ;;  %1108 = vmatpush.bf16.msrb.mxu1 %v2494_v15 }
 0x1d6   :  { %1121 = vmatpush.bf16.msrb.mxu2 %v2521_v42  ;;  %1134 = vmatpush.bf16.msrb.mxu3 %v2514_v38 }
 0x1d9   :  { %1096 = vmatpush.bf16.msrb.mxu0 %v2504_v28  ;;  %1109 = vmatpush.bf16.msrb.mxu1 %v2506_v29 }
 0x1da   :  { %1122 = vmatpush.bf16.msrb.mxu2 %v2529_v48  ;;  %1135 = vmatpush.bf16.msrb.mxu3 %v2526_v47 }
 0x238   :  { %v856_v57 = vpop.f32.mrf.mxu0  ;;  %v869_v53 = vpop.f32.mrf.mxu1 }
 0x239   :  { %v903_v30 = vrot.slane %v856_v57, 6  ;;  %v904_v36 = vrot.slane %v869_v53, 6 }
 0x23b   :  { %v911_v39 = vadd.f32 %v903_v30, %v2598_v5  ;;  %v912_v44 = vadd.f32 %v904_v36, %v2600_v6 }
 0x23d   :  { %v1967_v3 = vmul.f32 -1.442695, %v911_v39  ;;  %v1968_v7 = vmul.f32 -1.442695, %v912_v44 }
 0x23f   :  { %2115 = vpow2.f32 %v1967_v3  ;;  %v882_v11 = vpop.f32.mrf.mxu2  ;;  %v895_v12 = vpop.f32.mrf.mxu3 }
 0x240   :  { %2117 = vpow2.f32 %v1968_v7  ;;  %v858_v20 = vpop.f32.mrf.mxu0  ;;  %v871_v21 = vpop.f32.mrf.mxu1  ;;  %v906_v2 = vrot.slane %v895_v12, 6  ;;  %v905_v36 = vrot.slane %v882_v11, 6 }
 0x242   :  { %v914_v3 = vadd.f32 %v906_v2, %v2604_v4 }
 0x245   :  { %v2116_v62 = vpop.eup %2115 }
 0x246   :  { %v2118_v19 = vpop.eup %2117  ;;  %v918_v22 = vadd.f32 1.0, %v2116_v62 }
 0x247   :  { %v937_v41 = vadd.f32 1.0, %v2118_v19  ;;  %v884_v17 = vpop.f32.mrf.mxu2  ;;  %v897_v45 = vpop.f32.mrf.mxu3  ;;  %v913_v19 = vadd.f32 %v905_v36, %v2606_v16 }
 0x248   :  { %2119 = vrcp.f32 %v918_v22  ;;  %v930_v59 = vand.u32 2147483648, %v918_v22  ;;  %v928_v53 = vand.u32 2147483647, %v918_v22  ;;  %vm924_vm15 = vweird.f32 %v918_v22 }
 0x249   :  { %2121 = vrcp.f32 %v937_v41  ;;  %v949_v62 = vand.u32 2147483648, %v937_v41  ;;  %vm943_vm10 = vweird.f32 %v937_v41  ;;  %v947_v17 = vand.u32 2147483647, %v937_v41 }
 0x24a   :  { %v931_v44 = vor.u32 1.1754944e-38, %v930_v59  ;;  %vm929_vm8 = vcmp.eq.f32.partialorder %v928_v53, 8.507059e+37 }
 0x24b   :  { %vm948_vm12 = vcmp.eq.f32.partialorder %v947_v17, 8.507059e+37 }
 0x24e   :  { %v2120_v25 = vpop.eup %2119 }
 0x24f   :  { %v2122_v54 = vpop.eup %2121  ;;  %v920_v58 = vmul.f32 %v2120_v25, %v918_v22  ;;  %vm925_vm14 = vweird.f32 %v2120_v25 }
 0x250   :  { %v939_v27 = vmul.f32 %v2122_v54, %v937_v41  ;;  %vm926_vm7 = vmor %vm924_vm15, %vm925_vm14  ;;  %vm944_vm9 = vweird.f32 %v2122_v54 }
 0x251   :  { %v921_v56 = vsub.f32 1.0, %v920_v58  ;;  %vm945_vm11 = vmor %vm943_vm10, %vm944_vm9  ;;  %v950_v58 = vor.u32 1.1754944e-38, %v949_v62 }
 0x252   :  { %v940_v34 = vsub.f32 1.0, %v939_v27 }
 0x253   :  { %v922_v57 = vmul.f32 %v2120_v25, %v921_v56 }
 0x254   :  { %v941_v30 = vmul.f32 %v2122_v54, %v940_v34 }
 0x255   :  { %v923_v39 = vadd.f32 %v2120_v25, %v922_v57  ;;  %v1568_v57 = vsel %vm161_vm0, %v2611_v63, %v2652_v40 }
 0x256   :  { %v942_v20 = vadd.f32 %v2122_v54, %v941_v30 }
 0x257   :  { %v927_v7 = vsel %vm926_vm7, %v2120_v25, %v923_v39  ;;  %v959_v25 = vrot.slane %v2652_v40, 7 }
 0x258   :  { %v932_v21 = vsel %vm929_vm8, %v931_v44, %v927_v7  ;;  %v946_v11 = vsel %vm945_vm11, %v2122_v54, %v942_v20 }
 0x259   :  { %v953_v12 = vmul.f32 %v932_v21, %v914_v3  ;;  %v951_v22 = vsel %vm948_vm12, %v950_v58, %v946_v11 }
 0x25a   :  { %v956_v27 = vsub.f32 1.0, %v951_v22  ;;  %v961_v59 = vmul.f32 %v959_v25, %v951_v22 }
 0x25b   :  { %v954_v45 = vadd.f32 %v953_v12, %v913_v19 }
 0x25d   :  { %2123 = vtanh.f32 %v954_v45 }
 0x263   :  { %v2124_v56 = vpop.eup %2123 }
 0x264   :  { %v957_v34 = vmul.f32 %v2124_v56, %v956_v27 }
 0x266   :  { %v2693_v2 = vadd.f32 %v961_v59, %v957_v34 }
 0x268   :  { %v963_v41 = vpack.c.bf16 %v2693_v2, %v2693_v2  ;;  %v2702_v54 = vsel %vm163_vm1, %v1568_v57, %v2693_v2 }
 0x26a   :  { %v965_v53 = vrot.slane %v963_v41, 1 }
 0x26c   :  { %975 = vmatmul.bf16.vlgmr.msra.gmra.mxu0 %v965_v53  ;;  %988 = vmatmul.bf16.vlgmr.msra.gmra.mxu1 %v965_v53 }
 0x26d   :  { %1001 = vmatmul.bf16.vlgmr.msra.gmra.mxu2 %v965_v53  ;;  %1014 = vmatmul.bf16.vlgmr.msra.gmra.mxu3 %v965_v53 }
 0x26e   :  { %1209 = vmatpush.bf16.msra.mxu0 %v2409_v35  ;;  %1222 = vmatpush.bf16.msra.mxu1 %v2413_v37 }
 0x26f   :  { %1235 = vmatpush.bf16.msra.mxu2 %v2444_v18  ;;  %1248 = vmatpush.bf16.msra.mxu3 %v2426_v55 }
 0x272   :  { %1210 = vmatpush.bf16.msra.mxu0 %v2421_v49  ;;  %1223 = vmatpush.bf16.msra.mxu1 %v2423_v50 }
 0x273   :  { %1236 = vmatpush.bf16.msra.mxu2 %v2458_v33  ;;  %1249 = vmatpush.bf16.msra.mxu3 %v2456_v32 }
 0x276   :  { %1211 = vmatpush.bf16.msra.mxu0 %v2436_v8  ;;  %1224 = vmatpush.bf16.msra.mxu1 %v2441_v13 }
 0x277   :  { %1237 = vmatpush.bf16.msra.mxu2 %v2464_v46  ;;  %1250 = vmatpush.bf16.msra.mxu3 %v2461_v43 }
 0x27a   :  { %1212 = vmatpush.bf16.msra.mxu0 %v2450_v26  ;;  %1225 = vmatpush.bf16.msra.mxu1 %v2454_v31 }
 0x27b   :  { %1238 = vmatpush.bf16.msra.mxu2 %v2476_v61  ;;  %1251 = vmatpush.bf16.msra.mxu3 %v2473_v60 }
 0x27e   :  { %1213 = vmatpush.bf16.msra.mxu0 %v2468_v51  ;;  %1226 = vmatpush.bf16.msra.mxu1 %v2470_v52 }
 0x27f   :  { %1239 = vmatpush.bf16.msra.mxu2 %v2488_v10  ;;  %1252 = vmatpush.bf16.msra.mxu3 %v2485_v9 }
 0x282   :  { %1214 = vmatpush.bf16.msra.mxu0 %v2480_v0  ;;  %1227 = vmatpush.bf16.msra.mxu1 %v2482_v1 }
 0x283   :  { %1240 = vmatpush.bf16.msra.mxu2 %v2500_v24  ;;  %1253 = vmatpush.bf16.msra.mxu3 %v2497_v23 }
 0x286   :  { %1215 = vmatpush.bf16.msra.mxu0 %v2492_v14  ;;  %1228 = vmatpush.bf16.msra.mxu1 %v2494_v15 }
 0x287   :  { %1241 = vmatpush.bf16.msra.mxu2 %v2521_v42  ;;  %1254 = vmatpush.bf16.msra.mxu3 %v2514_v38 }
 0x28a   :  { %1216 = vmatpush.bf16.msra.mxu0 %v2504_v28  ;;  %1229 = vmatpush.bf16.msra.mxu1 %v2506_v29 }
 0x28b   :  { %1242 = vmatpush.bf16.msra.mxu2 %v2529_v48  ;;  %1255 = vmatpush.bf16.msra.mxu3 %v2526_v47 }
 0x2e9   :  { %v976_v63 = vpop.f32.mrf.mxu0  ;;  %v989_v40 = vpop.f32.mrf.mxu1 }
 0x2ea   :  { %v1023_v30 = vrot.slane %v976_v63, 5  ;;  %v1024_v36 = vrot.slane %v989_v40, 5 }
 0x2ec   :  { %v1031_v39 = vadd.f32 %v1023_v30, %v2598_v5  ;;  %v1032_v44 = vadd.f32 %v1024_v36, %v2600_v6 }
 0x2ee   :  { %v1969_v3 = vmul.f32 -1.442695, %v1031_v39  ;;  %v1970_v7 = vmul.f32 -1.442695, %v1032_v44 }
 0x2f0   :  { %2125 = vpow2.f32 %v1969_v3  ;;  %v1002_v20 = vpop.f32.mrf.mxu2  ;;  %v1015_v21 = vpop.f32.mrf.mxu3 }
 0x2f1   :  { %2127 = vpow2.f32 %v1970_v7  ;;  %v978_v62 = vpop.f32.mrf.mxu0  ;;  %v991_v19 = vpop.f32.mrf.mxu1  ;;  %v1026_v53 = vrot.slane %v1015_v21, 5  ;;  %v1025_v36 = vrot.slane %v1002_v20, 5 }
 0x2f3   :  { %v1034_v3 = vadd.f32 %v1026_v53, %v2604_v4 }
 0x2f6   :  { %v2126_v12 = vpop.eup %2125 }
 0x2f7   :  { %v2128_v17 = vpop.eup %2127  ;;  %v1038_v45 = vadd.f32 1.0, %v2126_v12 }
 0x2f8   :  { %v1057_v11 = vadd.f32 1.0, %v2128_v17  ;;  %v1004_v58 = vpop.f32.mrf.mxu2  ;;  %v1017_v22 = vpop.f32.mrf.mxu3  ;;  %v1033_v17 = vadd.f32 %v1025_v36, %v2606_v16 }
 0x2f9   :  { %2129 = vrcp.f32 %v1038_v45  ;;  %v1050_v41 = vand.u32 2147483648, %v1038_v45  ;;  %v1048_v40 = vand.u32 2147483647, %v1038_v45  ;;  %vm1044_vm1 = vweird.f32 %v1038_v45 }
 0x2fa   :  { %2131 = vrcp.f32 %v1057_v11  ;;  %v1069_v12 = vand.u32 2147483648, %v1057_v11  ;;  %vm1063_vm7 = vweird.f32 %v1057_v11  ;;  %v1067_v58 = vand.u32 2147483647, %v1057_v11 }
 0x2fb   :  { %v1051_v44 = vor.u32 1.1754944e-38, %v1050_v41  ;;  %vm1049_vm14 = vcmp.eq.f32.partialorder %v1048_v40, 8.507059e+37 }
 0x2fc   :  { %vm1068_vm9 = vcmp.eq.f32.partialorder %v1067_v58, 8.507059e+37 }
 0x2ff   :  { %v2130_v27 = vpop.eup %2129 }
 0x300   :  { %v2132_v25 = vpop.eup %2131  ;;  %v1040_v56 = vmul.f32 %v2130_v27, %v1038_v45  ;;  %vm1045_vm0 = vweird.f32 %v2130_v27 }
 0x301   :  { %v1059_v34 = vmul.f32 %v2132_v25, %v1057_v11  ;;  %vm1046_vm13 = vmor %vm1044_vm1, %vm1045_vm0  ;;  %vm1064_vm15 = vweird.f32 %v2132_v25 }
 0x302   :  { %v1041_v59 = vsub.f32 1.0, %v1040_v56  ;;  %vm1065_vm8 = vmor %vm1063_vm7, %vm1064_vm15  ;;  %v1070_v56 = vor.u32 1.1754944e-38, %v1069_v12 }
 0x303   :  { %v1060_v57 = vsub.f32 1.0, %v1059_v34 }
 0x304   :  { %v1042_v63 = vmul.f32 %v2130_v27, %v1041_v59 }
 0x305   :  { %v1061_v30 = vmul.f32 %v2132_v25, %v1060_v57 }
 0x306   :  { %v1043_v39 = vadd.f32 %v2130_v27, %v1042_v63 }
 0x307   :  { %v1062_v62 = vadd.f32 %v2132_v25, %v1061_v30 }
 0x308   :  { %v1047_v7 = vsel %vm1046_vm13, %v2130_v27, %v1043_v39  ;;  %v1079_v27 = vrot.slane %v2693_v2, 7 }
 0x309   :  { %v1052_v19 = vsel %vm1049_vm14, %v1051_v44, %v1047_v7  ;;  %v1066_v20 = vsel %vm1065_vm8, %v2132_v25, %v1062_v62 }
 0x30a   :  { %v1073_v21 = vmul.f32 %v1052_v19, %v1034_v3  ;;  %v1071_v45 = vsel %vm1068_vm9, %v1070_v56, %v1066_v20 }
 0x30b   :  { %v1076_v34 = vsub.f32 1.0, %v1071_v45  ;;  %v1081_v41 = vmul.f32 %v1079_v27, %v1071_v45 }
 0x30c   :  { %v1074_v22 = vadd.f32 %v1073_v21, %v1033_v17 }
 0x30e   :  { %2133 = vtanh.f32 %v1074_v22 }
 0x314   :  { %v2134_v59 = vpop.eup %2133 }
 0x315   :  { %v1077_v57 = vmul.f32 %v2134_v59, %v1076_v34 }
 0x317   :  { %v2741_v53 = vadd.f32 %v1081_v41, %v1077_v57 }
 0x319   :  { %v1083_v63 = vpack.c.bf16 %v2741_v53, %v2741_v53  ;;  %v2748_v11 = vsel %vm165_vm2, %v2702_v54, %v2741_v53 }
 0x31b   :  { %v1085_v25 = vshrl.u32 %v1083_v63, 16 }
 0x31d   :  { %v1087_v40 = vrot.slane %v1085_v25, 1 }
 0x31f   :  { %1097 = vmatmul.bf16.vlgmr.msrb.gmra.mxu0 %v1087_v40  ;;  %1110 = vmatmul.bf16.vlgmr.msrb.gmra.mxu1 %v1087_v40 }
 0x320   :  { %1123 = vmatmul.bf16.vlgmr.msrb.gmra.mxu2 %v1087_v40  ;;  %1136 = vmatmul.bf16.vlgmr.msrb.gmra.mxu3 %v1087_v40 }
 0x321   :  { %1331 = vmatpush.bf16.msrb.mxu0 %v2409_v35  ;;  %1344 = vmatpush.bf16.msrb.mxu1 %v2413_v37 }
 0x322   :  { %1357 = vmatpush.bf16.msrb.mxu2 %v2444_v18  ;;  %1370 = vmatpush.bf16.msrb.mxu3 %v2426_v55 }
 0x325   :  { %1332 = vmatpush.bf16.msrb.mxu0 %v2421_v49  ;;  %1345 = vmatpush.bf16.msrb.mxu1 %v2423_v50 }
 0x326   :  { %1358 = vmatpush.bf16.msrb.mxu2 %v2458_v33  ;;  %1371 = vmatpush.bf16.msrb.mxu3 %v2456_v32 }
 0x329   :  { %1333 = vmatpush.bf16.msrb.mxu0 %v2436_v8  ;;  %1346 = vmatpush.bf16.msrb.mxu1 %v2441_v13 }
 0x32a   :  { %1359 = vmatpush.bf16.msrb.mxu2 %v2464_v46  ;;  %1372 = vmatpush.bf16.msrb.mxu3 %v2461_v43 }
 0x32d   :  { %1334 = vmatpush.bf16.msrb.mxu0 %v2450_v26  ;;  %1347 = vmatpush.bf16.msrb.mxu1 %v2454_v31 }
 0x32e   :  { %1360 = vmatpush.bf16.msrb.mxu2 %v2476_v61  ;;  %1373 = vmatpush.bf16.msrb.mxu3 %v2473_v60 }
 0x331   :  { %1335 = vmatpush.bf16.msrb.mxu0 %v2468_v51  ;;  %1348 = vmatpush.bf16.msrb.mxu1 %v2470_v52 }
 0x332   :  { %1361 = vmatpush.bf16.msrb.mxu2 %v2488_v10  ;;  %1374 = vmatpush.bf16.msrb.mxu3 %v2485_v9 }
 0x335   :  { %1336 = vmatpush.bf16.msrb.mxu0 %v2480_v0  ;;  %1349 = vmatpush.bf16.msrb.mxu1 %v2482_v1 }
 0x336   :  { %1362 = vmatpush.bf16.msrb.mxu2 %v2500_v24  ;;  %1375 = vmatpush.bf16.msrb.mxu3 %v2497_v23 }
 0x339   :  { %1337 = vmatpush.bf16.msrb.mxu0 %v2492_v14  ;;  %1350 = vmatpush.bf16.msrb.mxu1 %v2494_v15 }
 0x33a   :  { %1363 = vmatpush.bf16.msrb.mxu2 %v2521_v42  ;;  %1376 = vmatpush.bf16.msrb.mxu3 %v2514_v38 }
 0x33d   :  { %1338 = vmatpush.bf16.msrb.mxu0 %v2504_v28  ;;  %1351 = vmatpush.bf16.msrb.mxu1 %v2506_v29 }
 0x33e   :  { %1364 = vmatpush.bf16.msrb.mxu2 %v2529_v48  ;;  %1377 = vmatpush.bf16.msrb.mxu3 %v2526_v47 }
 0x39c   :  { %v1098_v2 = vpop.f32.mrf.mxu0  ;;  %v1111_v54 = vpop.f32.mrf.mxu1 }
 0x39d   :  { %v1145_v30 = vrot.slane %v1098_v2, 4  ;;  %v1146_v36 = vrot.slane %v1111_v54, 4 }
 0x39f   :  { %v1153_v39 = vadd.f32 %v1145_v30, %v2598_v5  ;;  %v1154_v44 = vadd.f32 %v1146_v36, %v2600_v6 }
 0x3a1   :  { %v1971_v3 = vmul.f32 -1.442695, %v1153_v39  ;;  %v1972_v7 = vmul.f32 -1.442695, %v1154_v44 }
 0x3a3   :  { %2135 = vpow2.f32 %v1971_v3  ;;  %v1124_v62 = vpop.f32.mrf.mxu2  ;;  %v1137_v19 = vpop.f32.mrf.mxu3 }
 0x3a4   :  { %2137 = vpow2.f32 %v1972_v7  ;;  %v1100_v12 = vpop.f32.mrf.mxu0  ;;  %v1113_v17 = vpop.f32.mrf.mxu1  ;;  %v1148_v40 = vrot.slane %v1137_v19, 4  ;;  %v1147_v36 = vrot.slane %v1124_v62, 4 }
 0x3a6   :  { %v1156_v3 = vadd.f32 %v1148_v40, %v2604_v4 }
 0x3a9   :  { %v2136_v21 = vpop.eup %2135 }
 0x3aa   :  { %v2138_v58 = vpop.eup %2137  ;;  %v1160_v22 = vadd.f32 1.0, %v2136_v21 }
 0x3ab   :  { %v1179_v20 = vadd.f32 1.0, %v2138_v58  ;;  %v1126_v56 = vpop.f32.mrf.mxu2  ;;  %v1139_v45 = vpop.f32.mrf.mxu3  ;;  %v1155_v58 = vadd.f32 %v1147_v36, %v2606_v16 }
 0x3ac   :  { %2139 = vrcp.f32 %v1160_v22  ;;  %v1172_v25 = vand.u32 2147483648, %v1160_v22  ;;  %v1170_v54 = vand.u32 2147483647, %v1160_v22  ;;  %vm1166_vm10 = vweird.f32 %v1160_v22 }
 0x3ad   :  { %2141 = vrcp.f32 %v1179_v20  ;;  %v1191_v21 = vand.u32 2147483648, %v1179_v20  ;;  %vm1185_vm1 = vweird.f32 %v1179_v20  ;;  %v1189_v56 = vand.u32 2147483647, %v1179_v20 }
 0x3ae   :  { %v1173_v44 = vor.u32 1.1754944e-38, %v1172_v25  ;;  %vm1171_vm12 = vcmp.eq.f32.partialorder %v1170_v54, 8.507059e+37 }
 0x3af   :  { %vm1190_vm14 = vcmp.eq.f32.partialorder %v1189_v56, 8.507059e+37 }
 0x3b2   :  { %v2140_v34 = vpop.eup %2139 }
 0x3b3   :  { %v2142_v27 = vpop.eup %2141  ;;  %v1162_v59 = vmul.f32 %v2140_v34, %v1160_v22  ;;  %vm1167_vm2 = vweird.f32 %v2140_v34 }
 0x3b4   :  { %v1181_v57 = vmul.f32 %v2142_v27, %v1179_v20  ;;  %vm1168_vm11 = vmor %vm1166_vm10, %vm1167_vm2  ;;  %vm1186_vm0 = vweird.f32 %v2142_v27 }
 0x3b5   :  { %v1163_v41 = vsub.f32 1.0, %v1162_v59  ;;  %vm1187_vm13 = vmor %vm1185_vm1, %vm1186_vm0  ;;  %v1192_v59 = vor.u32 1.1754944e-38, %v1191_v21 }
 0x3b6   :  { %v1182_v63 = vsub.f32 1.0, %v1181_v57 }
 0x3b7   :  { %v1164_v2 = vmul.f32 %v2140_v34, %v1163_v41 }
 0x3b8   :  { %v1183_v30 = vmul.f32 %v2142_v27, %v1182_v63 }
 0x3b9   :  { %v1165_v39 = vadd.f32 %v2140_v34, %v1164_v2 }
 0x3ba   :  { %v1184_v12 = vadd.f32 %v2142_v27, %v1183_v30 }
 0x3bb   :  { %v1169_v7 = vsel %vm1168_vm11, %v2140_v34, %v1165_v39  ;;  %v1201_v34 = vrot.slane %v2741_v53, 7 }
 0x3bc   :  { %v1174_v17 = vsel %vm1171_vm12, %v1173_v44, %v1169_v7  ;;  %v1188_v62 = vsel %vm1187_vm13, %v2142_v27, %v1184_v12 }
 0x3bd   :  { %v1195_v19 = vmul.f32 %v1174_v17, %v1156_v3  ;;  %v1193_v22 = vsel %vm1190_vm14, %v1192_v59, %v1188_v62 }
 0x3be   :  { %v1198_v57 = vsub.f32 1.0, %v1193_v22  ;;  %v1203_v25 = vmul.f32 %v1201_v34, %v1193_v22 }
 0x3bf   :  { %v1196_v45 = vadd.f32 %v1195_v19, %v1155_v58 }
 0x3c1   :  { %2143 = vtanh.f32 %v1196_v45 }
 0x3c7   :  { %v2144_v41 = vpop.eup %2143 }
 0x3c8   :  { %v1199_v63 = vmul.f32 %v2144_v41, %v1198_v57 }
 0x3ca   :  { %v2787_v40 = vadd.f32 %v1203_v25, %v1199_v63 }
 0x3cc   :  { %v1205_v2 = vpack.c.bf16 %v2787_v40, %v2787_v40  ;;  %v2794_v20 = vsel %vm167_vm3, %v2748_v11, %v2787_v40  ;;  %v1321_v19 = vrot.slane %v2787_v40, 7 }
 0x3ce   :  { %v1207_v27 = vrot.slane %v1205_v2, 2 }
 0x3d0   :  { %1217 = vmatmul.bf16.vlgmr.msra.gmra.mxu0 %v1207_v27  ;;  %1230 = vmatmul.bf16.vlgmr.msra.gmra.mxu1 %v1207_v27 }
 0x3d1   :  { %1243 = vmatmul.bf16.vlgmr.msra.gmra.mxu2 %v1207_v27  ;;  %1256 = vmatmul.bf16.vlgmr.msra.gmra.mxu3 %v1207_v27 }
 0x3d2   :  { %1451 = vmatpush.bf16.msra.mxu0 %v2409_v35  ;;  %1464 = vmatpush.bf16.msra.mxu1 %v2413_v37 }
 0x3d3   :  { %1477 = vmatpush.bf16.msra.mxu2 %v2444_v18  ;;  %1490 = vmatpush.bf16.msra.mxu3 %v2426_v55 }
 0x3d6   :  { %1452 = vmatpush.bf16.msra.mxu0 %v2421_v49  ;;  %1465 = vmatpush.bf16.msra.mxu1 %v2423_v50 }
 0x3d7   :  { %1478 = vmatpush.bf16.msra.mxu2 %v2458_v33  ;;  %1491 = vmatpush.bf16.msra.mxu3 %v2456_v32 }
 0x3da   :  { %1453 = vmatpush.bf16.msra.mxu0 %v2436_v8  ;;  %1466 = vmatpush.bf16.msra.mxu1 %v2441_v13 }
 0x3db   :  { %1479 = vmatpush.bf16.msra.mxu2 %v2464_v46  ;;  %1492 = vmatpush.bf16.msra.mxu3 %v2461_v43 }
 0x3de   :  { %1454 = vmatpush.bf16.msra.mxu0 %v2450_v26  ;;  %1467 = vmatpush.bf16.msra.mxu1 %v2454_v31 }
 0x3df   :  { %1480 = vmatpush.bf16.msra.mxu2 %v2476_v61  ;;  %1493 = vmatpush.bf16.msra.mxu3 %v2473_v60 }
 0x3e2   :  { %1455 = vmatpush.bf16.msra.mxu0 %v2468_v51  ;;  %1468 = vmatpush.bf16.msra.mxu1 %v2470_v52 }
 0x3e3   :  { %1481 = vmatpush.bf16.msra.mxu2 %v2488_v10  ;;  %1494 = vmatpush.bf16.msra.mxu3 %v2485_v9 }
 0x3e6   :  { %1456 = vmatpush.bf16.msra.mxu0 %v2480_v0  ;;  %1469 = vmatpush.bf16.msra.mxu1 %v2482_v1 }
 0x3e7   :  { %1482 = vmatpush.bf16.msra.mxu2 %v2500_v24  ;;  %1495 = vmatpush.bf16.msra.mxu3 %v2497_v23 }
 0x3ea   :  { %1457 = vmatpush.bf16.msra.mxu0 %v2492_v14  ;;  %1470 = vmatpush.bf16.msra.mxu1 %v2494_v15 }
 0x3eb   :  { %1483 = vmatpush.bf16.msra.mxu2 %v2521_v42  ;;  %1496 = vmatpush.bf16.msra.mxu3 %v2514_v38 }
 0x3ee   :  { %1458 = vmatpush.bf16.msra.mxu0 %v2504_v28  ;;  %1471 = vmatpush.bf16.msra.mxu1 %v2506_v29 }
 0x3ef   :  { %1484 = vmatpush.bf16.msra.mxu2 %v2529_v48  ;;  %1497 = vmatpush.bf16.msra.mxu3 %v2526_v47 }
 0x44d   :  { %v1218_v35 = vpop.f32.mrf.mxu0  ;;  %v1231_v37 = vpop.f32.mrf.mxu1 }
 0x44e   :  { %v1265_v49 = vrot.slane %v1218_v35, 3  ;;  %v1266_v50 = vrot.slane %v1231_v37, 3 }
 0x450   :  { %v1273_v55 = vadd.f32 %v1265_v49, %v2598_v5  ;;  %v1274_v8 = vadd.f32 %v1266_v50, %v2600_v6 }
 0x452   :  { %v1973_v13 = vmul.f32 -1.442695, %v1273_v55  ;;  %v1974_v18 = vmul.f32 -1.442695, %v1274_v8 }
 0x454   :  { %2145 = vpow2.f32 %v1973_v13  ;;  %v1244_v26 = vpop.f32.mrf.mxu2  ;;  %v1257_v31 = vpop.f32.mrf.mxu3 }
 0x455   :  { %2147 = vpow2.f32 %v1974_v18  ;;  %v1220_v32 = vpop.f32.mrf.mxu0  ;;  %v1233_v33 = vpop.f32.mrf.mxu1  ;;  %v1268_v24 = vrot.slane %v1257_v31, 3  ;;  %v1267_v42 = vrot.slane %v1244_v26, 3 }
 0x457   :  { %v1276_v53 = vadd.f32 %v1268_v24, %v2604_v4  ;;  %v1275_v39 = vadd.f32 %v1267_v42, %v2606_v16 }
 0x45a   :  { %v2146_v43 = vpop.eup %2145 }
 0x45b   :  { %v2148_v46 = vpop.eup %2147  ;;  %v1280_v51 = vadd.f32 1.0, %v2146_v43 }
 0x45c   :  { %v1299_v52 = vadd.f32 1.0, %v2148_v46  ;;  %v1246_v60 = vpop.f32.mrf.mxu2  ;;  %v1259_v61 = vpop.f32.mrf.mxu3 }
 0x45d   :  { %2149 = vrcp.f32 %v1280_v51  ;;  %v1292_v23 = vand.u32 2147483648, %v1280_v51  ;;  %v1290_v29 = vand.u32 2147483647, %v1280_v51  ;;  %vm1286_vm15 = vweird.f32 %v1280_v51 }
 0x45e   :  { %2151 = vrcp.f32 %v1299_v52  ;;  %v1311_v36 = vand.u32 2147483648, %v1299_v52  ;;  %vm1305_vm2 = vweird.f32 %v1299_v52  ;;  %v1309_v3 = vand.u32 2147483647, %v1299_v52 }
 0x45f   :  { %v1293_v48 = vor.u32 1.1754944e-38, %v1292_v23  ;;  %vm1291_vm8 = vcmp.eq.f32.partialorder %v1290_v29, 8.507059e+37 }
 0x460   :  { %v1312_v17 = vor.u32 1.1754944e-38, %v1311_v36  ;;  %vm1310_vm11 = vcmp.eq.f32.partialorder %v1309_v3, 8.507059e+37 }
 0x463   :  { %v2150_v0 = vpop.eup %2149 }
 0x464   :  { %v2152_v1 = vpop.eup %2151  ;;  %v1282_v9 = vmul.f32 %v2150_v0, %v1280_v51  ;;  %vm1287_vm3 = vweird.f32 %v2150_v0 }
 0x465   :  { %v1301_v10 = vmul.f32 %v2152_v1, %v1299_v52  ;;  %vm1288_vm7 = vmor %vm1286_vm15, %vm1287_vm3  ;;  %vm1306_vm9 = vweird.f32 %v2152_v1 }
 0x466   :  { %v1283_v14 = vsub.f32 1.0, %v1282_v9  ;;  %vm1307_vm10 = vmor %vm1305_vm2, %vm1306_vm9 }
 0x467   :  { %v1302_v15 = vsub.f32 1.0, %v1301_v10 }
 0x468   :  { %v1284_v28 = vmul.f32 %v2150_v0, %v1283_v14 }
 0x469   :  { %v1303_v38 = vmul.f32 %v2152_v1, %v1302_v15 }
 0x46a   :  { %v1285_v47 = vadd.f32 %v2150_v0, %v1284_v28 }
 0x46b   :  { %v1304_v54 = vadd.f32 %v2152_v1, %v1303_v38 }
 0x46c   :  { %v1289_v11 = vsel %vm1288_vm7, %v2150_v0, %v1285_v47 }
 0x46d   :  { %v1294_v30 = vsel %vm1291_vm8, %v1293_v48, %v1289_v11  ;;  %v1308_v12 = vsel %vm1307_vm10, %v2152_v1, %v1304_v54 }
 0x46e   :  { %v1315_v44 = vmul.f32 %v1294_v30, %v1276_v53  ;;  %v1313_v21 = vsel %vm1310_vm11, %v1312_v17, %v1308_v12 }
 0x46f   :  { %v1318_v58 = vsub.f32 1.0, %v1313_v21  ;;  %v1323_v62 = vmul.f32 %v1321_v19, %v1313_v21 }
 0x470   :  { %v1316_v7 = vadd.f32 %v1315_v44, %v1275_v39 }
 0x472   :  { %2153 = vtanh.f32 %v1316_v7 }
 0x478   :  { %v2154_v56 = vpop.eup %2153 }
 0x479   :  { %v1319_v45 = vmul.f32 %v2154_v56, %v1318_v58 }
 0x47b   :  { %v2833_v59 = vadd.f32 %v1323_v62, %v1319_v45  ;;  %v2082_v45 = vld [vmem:[#allocation10 + $0x38] sm:$0xff]  ;;  %v2081_v62 = vld [vmem:[#allocation10 + $0x30] sm:$0xff] }
 0x47d   :  { %v1325_v22 = vpack.c.bf16 %v2833_v59, %v2833_v59  ;;  %v2840_v57 = vsel %vm169_vm4, %v2794_v20, %v2833_v59  ;;  %v1443_v3 = vrot.slane %v2833_v59, 7  ;;  %v2080_v59 = vld [vmem:[#allocation10 + $0x28] sm:$0xff] }
 0x47f   :  { %v1327_v34 = vshrl.u32 %v1325_v22, 16 }
 0x481   :  { %v1329_v41 = vrot.slane %v1327_v34, 2 }
 0x483   :  { %1339 = vmatmul.bf16.vlgmr.msrb.gmra.mxu0 %v1329_v41  ;;  %1352 = vmatmul.bf16.vlgmr.msrb.gmra.mxu1 %v1329_v41 }
 0x484   :  { %1365 = vmatmul.bf16.vlgmr.msrb.gmra.mxu2 %v1329_v41  ;;  %1378 = vmatmul.bf16.vlgmr.msrb.gmra.mxu3 %v1329_v41 }
 0x485   :  { %1644 = vmatpush.bf16.msrb.mxu0 %v2082_v45 }
 0x489   :  { %1645 = vmatpush.bf16.msrb.mxu0 %v2081_v62 }
 0x48d   :  { %1646 = vmatpush.bf16.msrb.mxu0 %v2080_v59 }
 0x500   :  { %v1340_v63 = vpop.f32.mrf.mxu0  ;;  %v1353_v25 = vpop.f32.mrf.mxu1 }
 0x501   :  { %v1387_v40 = vrot.slane %v1340_v63, 2  ;;  %v1388_v2 = vrot.slane %v1353_v25, 2  ;;  %v2079_v25 = vld [vmem:[#allocation10 + $0x20] sm:$0xff] }
 0x502   :  { %1647 = vmatpush.bf16.msrb.mxu0 %v2079_v25 }
 0x503   :  { %v1395_v27 = vadd.f32 %v1387_v40, %v2598_v5  ;;  %v1396_v35 = vadd.f32 %v1388_v2, %v2600_v6 }
 0x505   :  { %v1975_v37 = vmul.f32 -1.442695, %v1395_v27  ;;  %v1976_v49 = vmul.f32 -1.442695, %v1396_v35  ;;  %v2078_v35 = vld [vmem:[#allocation10 + $0x18] sm:$0xff] }
 0x506   :  { %1648 = vmatpush.bf16.msrb.mxu0 %v2078_v35 }
 0x507   :  { %2155 = vpow2.f32 %v1975_v37  ;;  %v1366_v50 = vpop.f32.mrf.mxu2  ;;  %v1379_v20 = vpop.f32.mrf.mxu3 }
 0x508   :  { %2157 = vpow2.f32 %v1976_v49  ;;  %v1342_v55 = vpop.f32.mrf.mxu0  ;;  %v1355_v8 = vpop.f32.mrf.mxu1  ;;  %v1390_v1 = vrot.slane %v1379_v20, 2  ;;  %v1389_v15 = vrot.slane %v1366_v50, 2 }
 0x509   :  { %v2077_v55 = vld [vmem:[#allocation10 + $0x10] sm:$0xff]  ;;  %v2076_v8 = vld [vmem:[#allocation10 + $0x8] sm:$0xff] }
 0x50a   :  { %v1398_v28 = vadd.f32 %v1390_v1, %v2604_v4  ;;  %v1397_v48 = vadd.f32 %v1389_v15, %v2606_v16  ;;  %1649 = vmatpush.bf16.msrb.mxu0 %v2077_v55 }
 0x50d   :  { %v2156_v13 = vpop.eup %2155 }
 0x50e   :  { %v2158_v18 = vpop.eup %2157  ;;  %v1402_v26 = vadd.f32 1.0, %v2156_v13  ;;  %1650 = vmatpush.bf16.msrb.mxu0 %v2076_v8 }
 0x50f   :  { %v1421_v31 = vadd.f32 1.0, %v2158_v18  ;;  %v1368_v32 = vpop.f32.mrf.mxu2  ;;  %v1381_v33 = vpop.f32.mrf.mxu3 }
 0x510   :  { %2159 = vrcp.f32 %v1402_v26  ;;  %v1414_v0 = vand.u32 2147483648, %v1402_v26  ;;  %v1412_v10 = vand.u32 2147483647, %v1402_v26  ;;  %vm1408_vm12 = vweird.f32 %v1402_v26  ;;  %v2075_v32 = vld [vmem:[#allocation10] sm:$0xff] }
 0x511   :  { %2161 = vrcp.f32 %v1421_v31  ;;  %v1433_v47 = vand.u32 2147483648, %v1421_v31  ;;  %vm1427_vm14 = vweird.f32 %v1421_v31  ;;  %v1431_v11 = vand.u32 2147483647, %v1421_v31 }
 0x512   :  { %v1415_v24 = vor.u32 1.1754944e-38, %v1414_v0  ;;  %vm1413_vm1 = vcmp.eq.f32.partialorder %v1412_v10, 8.507059e+37  ;;  %1651 = vmatpush.bf16.msrb.mxu0 %v2075_v32 }
 0x513   :  { %v1434_v36 = vor.u32 1.1754944e-38, %v1433_v47  ;;  %vm1432_vm15 = vcmp.eq.f32.partialorder %v1431_v11, 8.507059e+37 }
 0x516   :  { %v2160_v43 = vpop.eup %2159 }
 0x517   :  { %v2162_v46 = vpop.eup %2161  ;;  %v1404_v51 = vmul.f32 %v2160_v43, %v1402_v26  ;;  %vm1409_vm4 = vweird.f32 %v2160_v43 }
 0x518   :  { %v1423_v52 = vmul.f32 %v2162_v46, %v1421_v31  ;;  %vm1410_vm0 = vmor %vm1408_vm12, %vm1409_vm4  ;;  %vm1428_vm13 = vweird.f32 %v2162_v46 }
 0x519   :  { %v1405_v60 = vsub.f32 1.0, %v1404_v51  ;;  %vm1429_vm3 = vmor %vm1427_vm14, %vm1428_vm13 }
 0x51a   :  { %v1424_v61 = vsub.f32 1.0, %v1423_v52 }
 0x51b   :  { %v1406_v9 = vmul.f32 %v2160_v43, %v1405_v60 }
 0x51c   :  { %v1425_v14 = vmul.f32 %v2162_v46, %v1424_v61 }
 0x51d   :  { %v1407_v23 = vadd.f32 %v2160_v43, %v1406_v9 }
 0x51e   :  { %v1426_v38 = vadd.f32 %v2162_v46, %v1425_v14 }
 0x51f   :  { %v1411_v29 = vsel %vm1410_vm0, %v2160_v43, %v1407_v23 }
 0x520   :  { %v1416_v42 = vsel %vm1413_vm1, %v1415_v24, %v1411_v29  ;;  %v1430_v30 = vsel %vm1429_vm3, %v2162_v46, %v1426_v38 }
 0x521   :  { %v1437_v53 = vmul.f32 %v1416_v42, %v1398_v28  ;;  %v1435_v39 = vsel %vm1432_vm15, %v1434_v36, %v1430_v30 }
 0x522   :  { %v1440_v44 = vsub.f32 1.0, %v1435_v39  ;;  %v1445_v17 = vmul.f32 %v1443_v3, %v1435_v39 }
 0x523   :  { %v1438_v54 = vadd.f32 %v1437_v53, %v1397_v48 }
 0x525   :  { %2163 = vtanh.f32 %v1438_v54 }
 0x52b   :  { %v2164_v7 = vpop.eup %2163 }
 0x52c   :  { %v1441_v12 = vmul.f32 %v2164_v7, %v1440_v44 }
 0x52e   :  { %v2847_v21 = vadd.f32 %v1445_v17, %v1441_v12 }
 0x530   :  { %v1447_v58 = vpack.c.bf16 %v2847_v21, %v2847_v21  ;;  %v2854_v19 = vsel %vm171_vm5, %v2840_v57, %v2847_v21 }
 0x532   :  { %v1449_v56 = vrot.slane %v1447_v58, 3  ;;  %v2094_v58 = vld [vmem:[%s2878_s6] ss:$0 sm:$0xff] }
 0x534   :  { %1459 = vmatmul.bf16.vlgmr.msra.gmra.mxu0 %v1449_v56  ;;  %1472 = vmatmul.bf16.vlgmr.msra.gmra.mxu1 %v1449_v56 }
 0x535   :  { %1485 = vmatmul.bf16.vlgmr.msra.gmra.mxu2 %v1449_v56  ;;  %1498 = vmatmul.bf16.vlgmr.msra.gmra.mxu3 %v1449_v56 }
 0x5b1   :  { %v1460_v22 = vpop.f32.mrf.mxu0  ;;  %v1473_v34 = vpop.f32.mrf.mxu1 }
 0x5b2   :  { %v1507_v41 = vrot.slane %v1460_v22, 1  ;;  %v1508_v63 = vrot.slane %v1473_v34, 1 }
 0x5b4   :  { %v1515_v40 = vadd.f32 %v1507_v41, %v2598_v5  ;;  %v1516_v57 = vadd.f32 %v1508_v63, %v2600_v6 }
 0x5b6   :  { %v1977_v2 = vmul.f32 -1.442695, %v1515_v40  ;;  %v1978_v27 = vmul.f32 -1.442695, %v1516_v57 }
 0x5b8   :  { %2165 = vpow2.f32 %v1977_v2  ;;  %v1486_v37 = vpop.f32.mrf.mxu2  ;;  %v1499_v49 = vpop.f32.mrf.mxu3 }
 0x5b9   :  { %2167 = vpow2.f32 %v1978_v27  ;;  %v1462_v50 = vpop.f32.mrf.mxu0  ;;  %v1475_v20 = vpop.f32.mrf.mxu1  ;;  %v1510_v0 = vrot.slane %v1499_v49, 1  ;;  %v1509_v14 = vrot.slane %v1486_v37, 1 }
 0x5bb   :  { %v1518_v24 = vadd.f32 %v1510_v0, %v2604_v4  ;;  %v1517_v47 = vadd.f32 %v1509_v14, %v2606_v16  ;;  %v1563_v4 = vrot.slane %v2847_v21, 7 }
 0x5be   :  { %v2166_v13 = vpop.eup %2165 }
 0x5bf   :  { %v2168_v18 = vpop.eup %2167  ;;  %v1522_v26 = vadd.f32 1.0, %v2166_v13 }
 0x5c0   :  { %v1541_v5 = vadd.f32 1.0, %v2168_v18  ;;  %v1488_v31 = vpop.f32.mrf.mxu2  ;;  %v1501_v6 = vpop.f32.mrf.mxu3 }
 0x5c1   :  { %2169 = vrcp.f32 %v1522_v26  ;;  %v1534_v61 = vand.u32 2147483648, %v1522_v26  ;;  %v1532_v9 = vand.u32 2147483647, %v1522_v26  ;;  %vm1528_vm7 = vweird.f32 %v1522_v26 }
 0x5c2   :  { %2171 = vrcp.f32 %v1541_v5  ;;  %v1553_v42 = vand.u32 2147483648, %v1541_v5  ;;  %vm1547_vm10 = vweird.f32 %v1541_v5  ;;  %v1551_v53 = vand.u32 2147483647, %v1541_v5 }
 0x5c3   :  { %v1535_v23 = vor.u32 1.1754944e-38, %v1534_v61  ;;  %vm1533_vm9 = vcmp.eq.f32.partialorder %v1532_v9, 8.507059e+37 }
 0x5c4   :  { %v1554_v30 = vor.u32 1.1754944e-38, %v1553_v42  ;;  %vm1552_vm4 = vcmp.eq.f32.partialorder %v1551_v53, 8.507059e+37 }
 0x5c7   :  { %v2170_v33 = vpop.eup %2169 }
 0x5c8   :  { %v2172_v43 = vpop.eup %2171  ;;  %v1524_v46 = vmul.f32 %v2170_v33, %v1522_v26  ;;  %vm1529_vm5 = vweird.f32 %v2170_v33 }
 0x5c9   :  { %v1543_v51 = vmul.f32 %v2172_v43, %v1541_v5  ;;  %vm1530_vm8 = vmor %vm1528_vm7, %vm1529_vm5  ;;  %vm1548_vm2 = vweird.f32 %v2172_v43 }
 0x5ca   :  { %v1525_v52 = vsub.f32 1.0, %v1524_v46  ;;  %vm1549_vm11 = vmor %vm1547_vm10, %vm1548_vm2 }
 0x5cb   :  { %v1544_v60 = vsub.f32 1.0, %v1543_v51 }
 0x5cc   :  { %v1526_v1 = vmul.f32 %v2170_v33, %v1525_v52 }
 0x5cd   :  { %v1545_v10 = vmul.f32 %v2172_v43, %v1544_v60 }
 0x5ce   :  { %v1527_v15 = vadd.f32 %v2170_v33, %v1526_v1 }
 0x5cf   :  { %v1546_v29 = vadd.f32 %v2172_v43, %v1545_v10 }
 0x5d0   :  { %v1531_v28 = vsel %vm1530_vm8, %v2170_v33, %v1527_v15 }
 0x5d1   :  { %v1536_v38 = vsel %vm1533_vm9, %v1535_v23, %v1531_v28  ;;  %v1550_v54 = vsel %vm1549_vm11, %v2172_v43, %v1546_v29 }
 0x5d2   :  { %v1557_v48 = vmul.f32 %v1536_v38, %v1518_v24  ;;  %v1555_v36 = vsel %vm1552_vm4, %v1554_v30, %v1550_v54 }
 0x5d3   :  { %v1560_v39 = vsub.f32 1.0, %v1555_v36  ;;  %v1565_v7 = vmul.f32 %v1563_v4, %v1555_v36 }
 0x5d4   :  { %v1558_v11 = vadd.f32 %v1557_v48, %v1517_v47 }
 0x5d6   :  { %2173 = vtanh.f32 %v1558_v11 }
 0x5dc   :  { %v2174_v44 = vpop.eup %2173 }
 0x5dd   :  { %v1561_v3 = vmul.f32 %v2174_v44, %v1560_v39 }
 0x5df   :  { %v1566_v12 = vadd.f32 %v1565_v7, %v1561_v3 }
 0x5e1   :  { %1567 = vst [vmem:[%s2881_s9 - $0x7] sm:$0x80] %v1566_v12  ;;  %v1574_v16 = vsel %vm173_vm6, %v2854_v19, %v1566_v12  ;;  %s2331_s9 = smov [#allocation12]  }
 0x5e2   :  { %v1575_v17 = vpack.c.bf16 %v1574_v16, %v1574_v16  ;;  %s1673_s1 = sshll.u32 %s2331_s9, 4  ;;  %s1674_s1 = int_to_ptr.vmem [resolvable:$true] %s1673_s1 }
 0x5e4   :  { %1652 = vmatmul.bf16.vlgmr.msrb.gmra.mxu0 %v1575_v17 }
 0x661   :  { %v1653_v56 = vpop.f32.mrf.mxu0 }
 0x662   :  { %v1654_v45 = vadd.f32 %v2094_v58, %v1653_v56 }
 0x664   :  { %1657 = vmax.xlane.f32.xlu0 %v1654_v45 }
 0x669   :  { %v1655_v21 = vpop.f32.mrf.mxu0 }
 0x6d7   :  { %v1658_v62 = vpop.xlane.xlu0 %1657 }
 0x6d8   :  { %v1659_v59 = vsub.f32 %v1654_v45, %v1658_v62 }
 0x6da   :  { %v1660_v22 = vmul.f32 1.442695, %v1659_v59 }
 0x6dc   :  { %2175 = vpow2.f32 %v1660_v22 }
 0x6e2   :  { %v2176_v34 = vpop.eup %2175 }
 0x6e3   :  { %1662 = vadd.xlane.f32.xlu0 %v2176_v34 }
 0x756   :  { %v1663_v41 = vpop.xlane.xlu0 %1662 }
 0x757   :  { %2177 = vlog2.f32 %v1663_v41 }
 0x75d   :  { %v2178_v63 = vpop.eup %2177 }
 0x75e   :  { %v1665_v19 = vmul.f32 0.6931472, %v2178_v63 }
 0x760   :  { %v1666_v25 = vsub.f32 %v1659_v59, %v1665_v19 }
 0x762   :  { %1667 = vst [vmem:[#allocation12] sm:$0xff] %v1666_v25 }
 0x763   :  { %1678 = dma.vmem_to_hbm [thread:$0]  %s1674_s1, 128, %s1676_s13, [#allocation4]  }
 0x764   :  { %2319 = dma.done.wait [#allocation4], 128  }
 0x765   :  { %2320 = vsyncadd [#allocation4], 4294967168 }
 0x766   :  { %1687 = vsyncpa [#allocation3], 1 }
 0x767   :  { %1688 = vsyncpa [#allocation8], 1 }
 0x768   :  { %1689 = vsyncpa [#allocation11], 1 }
 0x769   :  { %1690 = vsyncpa [#allocation4], 1 }
 0x76a   :  { %1691 = vsyncpa [#allocation5], 1 }

</bundles_post_ra>
